<compile_context>
chip_gen: v5e
topology: v5e:2x2
jax: 0.10.0
libtpu: 0.0.40
codegen_flags: <defaults>
</compile_context>

<pallas_src>
import functools

import numpy as np
import jax
import jax.numpy as jnp
from jax.experimental import pallas as pl
from jax.experimental.pallas import tpu as pltpu


def _round_up(v, m):
    return ((v + m - 1) // m) * m


def _is_v5e():
    try:
        kind = jax.devices()[0].device_kind.lower()
        return ("v5 lite" in kind) or ("v5e" in kind) or ("v5lite" in kind)
    except Exception:
        return False


def _vmem_capacity_bytes():
    try:
        return int(pltpu.get_tpu_info().vmem_capacity_bytes)
    except Exception:
        return 64 << 20   # conservative default (v7x per-TensorCore)


def _vmem_need_bytes(TH, Wp, Wo, Cinp, TC, KH, KW, cbytes, obytes):
    """Per-grid-step working set (pipelined buffers counted twice)."""
    strip = TH * Wp * Cinp * cbytes
    halo = max(KH - 1, 1) * Wp * Cinp * cbytes
    wts = KH * KW * Cinp * TC * cbytes
    bias = TC * 4
    out = TH * Wo * TC * obytes
    xs = (TH + KH - 1) * Wp * Cinp * cbytes      # assembly scratch
    acc = TH * Wo * TC * 4                        # f32 accumulator temp
    win = TH * Wo * Cinp * cbytes                 # per-tap window temp
    return 2 * (strip + halo + wts + bias + out) + xs + acc + 2 * win


def _pick_th(Ho, Wo, Wp, Cinp, TC, KH, KW, cbytes, obytes, budget, target_m):
    """TH multiple of 8 (lane/sublane friendly M), targeting M=TH*Wo~target_m,
    shrunk until the working set fits the VMEM budget."""
    th = min(max(Ho, 1), max(1, (target_m + Wo - 1) // Wo))
    th = max(8, _round_up(th, 8))
    while th > 8 and _vmem_need_bytes(th, Wp, Wo, Cinp, TC, KH, KW,
                                      cbytes, obytes) > budget:
        th -= 8
    return th


def _wsconv2d_kernel(strip_ref, halo_ref, w_ref, b_ref, o_ref, xs_ref, *,
                     KH, KW, TH, Wo):
    # strip_ref : (TH, Wp, Cinp)        current row strip (compute dtype)
    # halo_ref  : (max(KH-1,1), Wp, Cinp) first rows of the NEXT strip
    # w_ref     : (KH*KW, Cinp, TC)     scale-folded weights, one Cout tile
    # b_ref     : (1, TC)               f32 bias tile
    # o_ref     : (TH*Wo, TC)           lane-dense output slab
    # xs_ref    : (TH + KH - 1, Wp, Cinp) VMEM assembly scratch
    Cinp = strip_ref.shape[-1]
    M, TC = o_ref.shape

    # Assemble strip + bottom halo contiguously in VMEM (cheap VMEM->VMEM
    # copy; replaces the old host-side halo'd-strip duplication in HBM).
    xs_ref[0:TH] = strip_ref[...]
    if KH > 1:
        xs_ref[TH:TH + KH - 1] = halo_ref[...]

    # Accumulate the KH*KW taps as separate MXU matmuls (K = Cinp each) into
    # an f32 accumulator. No im2col patch -> no lane-misaligned stores and no
    # large scratch buffer.
    acc = jnp.zeros((M, TC), jnp.float32)
    for kh in range(KH):
        for kw in range(KW):
            win = xs_ref[kh:kh + TH, kw:kw + Wo, :].reshape(M, Cinp)
            acc = acc + jnp.dot(win, w_ref[kh * KW + kw],
                                preferred_element_type=jnp.float32)

    # One dense, unmasked store stream (TC is a multiple of 128).
    o_ref[...] = (acc + b_ref[...].astype(jnp.float32)).astype(o_ref.dtype)


def wsconv2d_nhwc(x_nhwc, weight_oihw, bias, *, stride=1, padding=1, gain=2,
                  compute_dtype=jnp.bfloat16, target_m=1024):
    """Core NHWC entry point. x: (N,H,W,Cin); weight: (Cout,Cin,KH,KW)."""
    assert stride == 1, "TODO(synk): only stride=1 implemented (module default)"
    N, H, W, Cin = x_nhwc.shape
    Cout, wc_in, KH, KW = weight_oihw.shape
    assert wc_in == Cin
    out_dtype = x_nhwc.dtype
    cdtype = np.dtype(compute_dtype)
    cbytes = cdtype.itemsize
    obytes = np.dtype(out_dtype).itemsize
    scale = float((gain / (Cin * KH * KW)) ** 0.5)

    # Channel padding: Cout -> multiple of 128 (lane-dense stores), Cin -> x8.
    Cinp = _round_up(Cin, 8)
    Coutp = _round_up(Cout, 128)
    # v5e MXU is 128 wide -> TC=256 buys nothing there and doubles VMEM tiles.
    TC = 128 if (_is_v5e() or Coutp % 256 != 0) else 256
    nC = Coutp // TC

    Hp, Wp = H + 2 * padding, W + 2 * padding
    Ho, Wo = Hp - KH + 1, Wp - KW + 1

    capacity = _vmem_capacity_bytes()
    TH = _pick_th(Ho, Wo, Wp, Cinp, TC, KH, KW, cbytes, obytes,
                  budget=int(0.7 * capacity), target_m=target_m)
    nS = (Ho + TH - 1) // TH          # ragged tail handled by row padding
    Hop = nS * TH
    M = TH * Wo

    # Pad: conv halo (zeros) + bottom rows up to (nS+1)*TH (tail strip + halo
    # source) + channel pad, cast to the MXU compute dtype. The 5-D reshape is
    # contiguous -> free; NO duplicated strip tensor is materialized.
    x_pad = jnp.pad(
        x_nhwc.astype(cdtype),
        ((0, 0),
         (padding, (nS + 1) * TH - padding - H),
         (padding, padding),
         (0, Cinp - Cin)))
    x5d = x_pad.reshape(N, nS + 1, TH, Wp, Cinp)

    # Weights: OIHW -> (KH*KW, Cinp, Coutp), scale folded in, compute dtype.
    w = jnp.transpose(weight_oihw, (2, 3, 1, 0))            # (KH,KW,Cin,Cout)
    w = jnp.pad(w, ((0, 0), (0, 0), (0, Cinp - Cin), (0, Coutp - Cout))) * scale
    w3d = w.reshape(KH * KW, Cinp, Coutp).astype(cdtype)
    b2d = jnp.pad(bias.astype(jnp.float32), (0, Coutp - Cout)).reshape(1, Coutp)

    need = _vmem_need_bytes(TH, Wp, Wo, Cinp, TC, KH, KW, cbytes, obytes)
    vmem_limit = int(min(max(2 * need, 32 << 20), capacity))

    halo_rows = max(KH - 1, 1)
    kernel = functools.partial(_wsconv2d_kernel, KH=KH, KW=KW, TH=TH, Wo=Wo)

    # Grid order (N, nC, nS): weight block index depends only on c, so weights
    # are fetched once per Cout tile and stay resident across all row strips.
    out2d = pl.pallas_call(
        kernel,
        out_shape=jax.ShapeDtypeStruct((N, Hop * Wo, Coutp), out_dtype),
        grid_spec=pltpu.PrefetchScalarGridSpec(
            num_scalar_prefetch=0,
            grid=(N, nC, nS),
            in_specs=[
                # current strip (rows s*TH .. s*TH+TH-1 of the padded image)
                pl.BlockSpec((None, None, TH, Wp, Cinp),
                             lambda n, c, s: (n, s, 0, 0, 0)),
                # bottom halo = first KH-1 rows of strip s+1 (same array)
                pl.BlockSpec((None, None, halo_rows, Wp, Cinp),
                             lambda n, c, s: (n, s + 1, 0, 0, 0)),
                # weights: resident across the inner nS loop
                pl.BlockSpec((KH * KW, Cinp, TC), lambda n, c, s: (0, 0, c)),
                pl.BlockSpec((1, TC), lambda n, c, s: (0, c)),
            ],
            out_specs=pl.BlockSpec((None, M, TC), lambda n, c, s: (n, s, c)),
            scratch_shapes=[pltpu.VMEM((TH + KH - 1, Wp, Cinp), cdtype)],
        ),
        compiler_params=pltpu.CompilerParams(
            dimension_semantics=("parallel", "parallel", "parallel"),
            vmem_limit_bytes=vmem_limit),
    )(x5d, x5d, w3d, b2d)

    # Drop row/channel padding; reshape back to NHWC (contiguous, free).
    out = out2d.reshape(N, Hop, Wo, Coutp)[:, :Ho, :, :Cout]
    return out


def wsconv2d(x_nchw, weight_oihw, bias, **kwargs):
    """PyTorch-layout (NCHW) entry point. In a full ProGAN stack prefer
    wsconv2d_nhwc end-to-end to avoid two full-tensor transposes per layer."""
    x_nhwc = jnp.transpose(x_nchw, (0, 2, 3, 1))
    y = wsconv2d_nhwc(x_nhwc, weight_oihw, bias, **kwargs)
    return jnp.transpose(y, (0, 3, 1, 2))


def _reference(x_nchw, weight_oihw, bias, *, padding=1, gain=2):
    Cin, KH, KW = weight_oihw.shape[1], weight_oihw.shape[2], weight_oihw.shape[3]
    scale = (gain / (Cin * KH * KW)) ** 0.5
    y = jax.lax.conv_general_dilated(
        x_nchw * scale, weight_oihw,
        window_strides=(1, 1),
        padding=((padding, padding), (padding, padding)),
        dimension_numbers=("NCHW", "OIHW", "NCHW"))
    return y + bias.reshape(1, -1, 1, 1)


if __name__ == "__main__":
    key = jax.random.PRNGKey(0)
    kx, kw_key = jax.random.split(key)

    N, Cin, H, W = 2, 4, 16, 16
    Cout, K = 8, 3

    x = jax.random.normal(kx, (N, Cin, H, W), dtype=jnp.float32)
    weight = jax.random.normal(kw_key, (Cout, Cin, K, K), dtype=jnp.float32)  # nn.init.normal_
    bias = jnp.zeros((Cout,), dtype=jnp.float32)                              # nn.init.zeros_

    ref = jax.block_until_ready(_reference(x, weight, bias, padding=1, gain=2))

    # f32 MXU operands: tight tolerance against the f32 XLA conv reference.
    out32 = jax.block_until_ready(
        wsconv2d(x, weight, bias, compute_dtype=jnp.float32))
    assert out32.shape == (N, Cout, H, W)
    assert float(jnp.max(jnp.abs(out32 - ref))) < 1e-3

    # bf16 MXU operands (default, recommended for throughput): looser tolerance.
    out16 = jax.block_until_ready(wsconv2d(x, weight, bias))
    assert out16.shape == (N, Cout, H, W)
    assert float(jnp.max(jnp.abs(out16 - ref))) < 5e-2

    print("KERNEL_OK")
</pallas_src>

<mosaic_0001>
module attributes {stable_mosaic.version = 11 : i64} {
  func.func @_wsconv2d_kernel(%arg0: i32, %arg1: i32, %arg2: i32, %arg3: memref<1x1x16x18x8xf32, #tpu.memory_space<vmem>>, %arg4: memref<1x1x2x18x8xf32, #tpu.memory_space<vmem>>, %arg5: memref<9x8x128xf32, #tpu.memory_space<vmem>>, %arg6: memref<1x128xf32, #tpu.memory_space<vmem>>, %arg7: memref<1x256x128xf32, #tpu.memory_space<vmem>>, %arg8: memref<18x18x8xf32, #tpu.memory_space<vmem>>) attributes {dimension_semantics = [#tpu.dimension_semantics<parallel>, #tpu.dimension_semantics<parallel>, #tpu.dimension_semantics<parallel>], iteration_bounds = array<i64: 2, 1, 1>, scalar_prefetch = 0 : i64, scratch_operands = 1 : i64, tpu.core_type = #tpu.core_type<tc>, window_params = [{transform_indices = @transform_0, window_bounds = array<i64: 1, 1, 16, 18, 8>}, {transform_indices = @transform_1, window_bounds = array<i64: 1, 1, 2, 18, 8>}, {transform_indices = @transform_2, window_bounds = array<i64: 9, 8, 128>}, {transform_indices = @transform_3, window_bounds = array<i64: 1, 128>}, {transform_indices = @transform_4, window_bounds = array<i64: 1, 256, 128>}]} {
    %c0 = arith.constant 0 : index
    %c0_0 = arith.constant 0 : index
    %c0_1 = arith.constant 0 : index
    %c0_2 = arith.constant 0 : index
    %c0_3 = arith.constant 0 : index
    %0 = vector.load %arg3[%c0, %c0_0, %c0_1, %c0_2, %c0_3] : memref<1x1x16x18x8xf32, #tpu.memory_space<vmem>>, vector<1x1x16x18x8xf32>
    %1 = vector.shape_cast %0 : vector<1x1x16x18x8xf32> to vector<16x18x8xf32>
    %c0_4 = arith.constant 0 : index
    %c0_5 = arith.constant 0 : index
    %c0_6 = arith.constant 0 : index
    %2 = vector.load %arg8[%c0_4, %c0_5, %c0_6] : memref<18x18x8xf32, #tpu.memory_space<vmem>>, vector<16x18x8xf32>
    tpu.vector_store %arg8[%c0_4, %c0_5, %c0_6], %1 {strides = array<i32>} : memref<18x18x8xf32, #tpu.memory_space<vmem>>, vector<16x18x8xf32>,
    %c0_7 = arith.constant 0 : index
    %c0_8 = arith.constant 0 : index
    %c0_9 = arith.constant 0 : index
    %c0_10 = arith.constant 0 : index
    %c0_11 = arith.constant 0 : index
    %3 = vector.load %arg4[%c0_7, %c0_8, %c0_9, %c0_10, %c0_11] : memref<1x1x2x18x8xf32, #tpu.memory_space<vmem>>, vector<1x1x2x18x8xf32>
    %4 = vector.shape_cast %3 : vector<1x1x2x18x8xf32> to vector<2x18x8xf32>
    %c16 = arith.constant 16 : index
    %c0_12 = arith.constant 0 : index
    %c0_13 = arith.constant 0 : index
    %5 = vector.load %arg8[%c16, %c0_12, %c0_13] : memref<18x18x8xf32, #tpu.memory_space<vmem>>, vector<2x18x8xf32>
    tpu.vector_store %arg8[%c16, %c0_12, %c0_13], %4 {strides = array<i32>} : memref<18x18x8xf32, #tpu.memory_space<vmem>>, vector<2x18x8xf32>,
    %cst = arith.constant 0.000000e+00 : f32
    %6 = vector.broadcast %cst : f32 to vector<256x128xf32>
    %c0_14 = arith.constant 0 : index
    %c0_15 = arith.constant 0 : index
    %c0_16 = arith.constant 0 : index
    %7 = vector.load %arg8[%c0_14, %c0_15, %c0_16] : memref<18x18x8xf32, #tpu.memory_space<vmem>>, vector<16x16x8xf32>
    %8 = vector.shape_cast %7 : vector<16x16x8xf32> to vector<256x8xf32>
    %c0_17 = arith.constant 0 : index
    %c0_18 = arith.constant 0 : index
    %c0_19 = arith.constant 0 : index
    %9 = vector.load %arg5[%c0_17, %c0_18, %c0_19] : memref<9x8x128xf32, #tpu.memory_space<vmem>>, vector<1x8x128xf32>
    %10 = vector.shape_cast %9 : vector<1x8x128xf32> to vector<8x128xf32>
    %cst_20 = arith.constant dense<0.000000e+00> : vector<256x128xf32>
    %11 = tpu.matmul %8, %10, %cst_20 {dimension_numbers = #tpu.dot_dimension_numbers<[1], [0], [0], [1], [0, 0, 1, 1], [], []>} : vector<256x8xf32>, vector<8x128xf32>, vector<256x128xf32> -> vector<256x128xf32>
    %12 = arith.addf %6, %11 : vector<256x128xf32>
    %c0_21 = arith.constant 0 : index
    %c1 = arith.constant 1 : index
    %c0_22 = arith.constant 0 : index
    %13 = vector.load %arg8[%c0_21, %c1, %c0_22] : memref<18x18x8xf32, #tpu.memory_space<vmem>>, vector<16x16x8xf32>
    %14 = vector.shape_cast %13 : vector<16x16x8xf32> to vector<256x8xf32>
    %c1_23 = arith.constant 1 : index
    %c0_24 = arith.constant 0 : index
    %c0_25 = arith.constant 0 : index
    %15 = vector.load %arg5[%c1_23, %c0_24, %c0_25] : memref<9x8x128xf32, #tpu.memory_space<vmem>>, vector<1x8x128xf32>
    %16 = vector.shape_cast %15 : vector<1x8x128xf32> to vector<8x128xf32>
    %cst_26 = arith.constant dense<0.000000e+00> : vector<256x128xf32>
    %17 = tpu.matmul %14, %16, %cst_26 {dimension_numbers = #tpu.dot_dimension_numbers<[1], [0], [0], [1], [0, 0, 1, 1], [], []>} : vector<256x8xf32>, vector<8x128xf32>, vector<256x128xf32> -> vector<256x128xf32>
    %18 = arith.addf %12, %17 : vector<256x128xf32>
    %c0_27 = arith.constant 0 : index
    %c2 = arith.constant 2 : index
    %c0_28 = arith.constant 0 : index
    %19 = vector.load %arg8[%c0_27, %c2, %c0_28] : memref<18x18x8xf32, #tpu.memory_space<vmem>>, vector<16x16x8xf32>
    %20 = vector.shape_cast %19 : vector<16x16x8xf32> to vector<256x8xf32>
    %c2_29 = arith.constant 2 : index
    %c0_30 = arith.constant 0 : index
    %c0_31 = arith.constant 0 : index
    %21 = vector.load %arg5[%c2_29, %c0_30, %c0_31] : memref<9x8x128xf32, #tpu.memory_space<vmem>>, vector<1x8x128xf32>
    %22 = vector.shape_cast %21 : vector<1x8x128xf32> to vector<8x128xf32>
    %cst_32 = arith.constant dense<0.000000e+00> : vector<256x128xf32>
    %23 = tpu.matmul %20, %22, %cst_32 {dimension_numbers = #tpu.dot_dimension_numbers<[1], [0], [0], [1], [0, 0, 1, 1], [], []>} : vector<256x8xf32>, vector<8x128xf32>, vector<256x128xf32> -> vector<256x128xf32>
    %24 = arith.addf %18, %23 : vector<256x128xf32>
    %c1_33 = arith.constant 1 : index
    %c0_34 = arith.constant 0 : index
    %c0_35 = arith.constant 0 : index
    %25 = vector.load %arg8[%c1_33, %c0_34, %c0_35] : memref<18x18x8xf32, #tpu.memory_space<vmem>>, vector<16x16x8xf32>
    %26 = vector.shape_cast %25 : vector<16x16x8xf32> to vector<256x8xf32>
    %c3 = arith.constant 3 : index
    %c0_36 = arith.constant 0 : index
    %c0_37 = arith.constant 0 : index
    %27 = vector.load %arg5[%c3, %c0_36, %c0_37] : memref<9x8x128xf32, #tpu.memory_space<vmem>>, vector<1x8x128xf32>
    %28 = vector.shape_cast %27 : vector<1x8x128xf32> to vector<8x128xf32>
    %cst_38 = arith.constant dense<0.000000e+00> : vector<256x128xf32>
    %29 = tpu.matmul %26, %28, %cst_38 {dimension_numbers = #tpu.dot_dimension_numbers<[1], [0], [0], [1], [0, 0, 1, 1], [], []>} : vector<256x8xf32>, vector<8x128xf32>, vector<256x128xf32> -> vector<256x128xf32>
    %30 = arith.addf %24, %29 : vector<256x128xf32>
    %c1_39 = arith.constant 1 : index
    %c1_40 = arith.constant 1 : index
    %c0_41 = arith.constant 0 : index
    %31 = vector.load %arg8[%c1_39, %c1_40, %c0_41] : memref<18x18x8xf32, #tpu.memory_space<vmem>>, vector<16x16x8xf32>
    %32 = vector.shape_cast %31 : vector<16x16x8xf32> to vector<256x8xf32>
    %c4 = arith.constant 4 : index
    %c0_42 = arith.constant 0 : index
    %c0_43 = arith.constant 0 : index
    %33 = vector.load %arg5[%c4, %c0_42, %c0_43] : memref<9x8x128xf32, #tpu.memory_space<vmem>>, vector<1x8x128xf32>
    %34 = vector.shape_cast %33 : vector<1x8x128xf32> to vector<8x128xf32>
    %cst_44 = arith.constant dense<0.000000e+00> : vector<256x128xf32>
    %35 = tpu.matmul %32, %34, %cst_44 {dimension_numbers = #tpu.dot_dimension_numbers<[1], [0], [0], [1], [0, 0, 1, 1], [], []>} : vector<256x8xf32>, vector<8x128xf32>, vector<256x128xf32> -> vector<256x128xf32>
    %36 = arith.addf %30, %35 : vector<256x128xf32>
    %c1_45 = arith.constant 1 : index
    %c2_46 = arith.constant 2 : index
    %c0_47 = arith.constant 0 : index
    %37 = vector.load %arg8[%c1_45, %c2_46, %c0_47] : memref<18x18x8xf32, #tpu.memory_space<vmem>>, vector<16x16x8xf32>
    %38 = vector.shape_cast %37 : vector<16x16x8xf32> to vector<256x8xf32>
    %c5 = arith.constant 5 : index
    %c0_48 = arith.constant 0 : index
    %c0_49 = arith.constant 0 : index
    %39 = vector.load %arg5[%c5, %c0_48, %c0_49] : memref<9x8x128xf32, #tpu.memory_space<vmem>>, vector<1x8x128xf32>
    %40 = vector.shape_cast %39 : vector<1x8x128xf32> to vector<8x128xf32>
    %cst_50 = arith.constant dense<0.000000e+00> : vector<256x128xf32>
    %41 = tpu.matmul %38, %40, %cst_50 {dimension_numbers = #tpu.dot_dimension_numbers<[1], [0], [0], [1], [0, 0, 1, 1], [], []>} : vector<256x8xf32>, vector<8x128xf32>, vector<256x128xf32> -> vector<256x128xf32>
    %42 = arith.addf %36, %41 : vector<256x128xf32>
    %c2_51 = arith.constant 2 : index
    %c0_52 = arith.constant 0 : index
    %c0_53 = arith.constant 0 : index
    %43 = vector.load %arg8[%c2_51, %c0_52, %c0_53] : memref<18x18x8xf32, #tpu.memory_space<vmem>>, vector<16x16x8xf32>
    %44 = vector.shape_cast %43 : vector<16x16x8xf32> to vector<256x8xf32>
    %c6 = arith.constant 6 : index
    %c0_54 = arith.constant 0 : index
    %c0_55 = arith.constant 0 : index
    %45 = vector.load %arg5[%c6, %c0_54, %c0_55] : memref<9x8x128xf32, #tpu.memory_space<vmem>>, vector<1x8x128xf32>
    %46 = vector.shape_cast %45 : vector<1x8x128xf32> to vector<8x128xf32>
    %cst_56 = arith.constant dense<0.000000e+00> : vector<256x128xf32>
    %47 = tpu.matmul %44, %46, %cst_56 {dimension_numbers = #tpu.dot_dimension_numbers<[1], [0], [0], [1], [0, 0, 1, 1], [], []>} : vector<256x8xf32>, vector<8x128xf32>, vector<256x128xf32> -> vector<256x128xf32>
    %48 = arith.addf %42, %47 : vector<256x128xf32>
    %c2_57 = arith.constant 2 : index
    %c1_58 = arith.constant 1 : index
    %c0_59 = arith.constant 0 : index
    %49 = vector.load %arg8[%c2_57, %c1_58, %c0_59] : memref<18x18x8xf32, #tpu.memory_space<vmem>>, vector<16x16x8xf32>
    %50 = vector.shape_cast %49 : vector<16x16x8xf32> to vector<256x8xf32>
    %c7 = arith.constant 7 : index
    %c0_60 = arith.constant 0 : index
    %c0_61 = arith.constant 0 : index
    %51 = vector.load %arg5[%c7, %c0_60, %c0_61] : memref<9x8x128xf32, #tpu.memory_space<vmem>>, vector<1x8x128xf32>
    %52 = vector.shape_cast %51 : vector<1x8x128xf32> to vector<8x128xf32>
    %cst_62 = arith.constant dense<0.000000e+00> : vector<256x128xf32>
    %53 = tpu.matmul %50, %52, %cst_62 {dimension_numbers = #tpu.dot_dimension_numbers<[1], [0], [0], [1], [0, 0, 1, 1], [], []>} : vector<256x8xf32>, vector<8x128xf32>, vector<256x128xf32> -> vector<256x128xf32>
    %54 = arith.addf %48, %53 : vector<256x128xf32>
    %c2_63 = arith.constant 2 : index
    %c2_64 = arith.constant 2 : index
    %c0_65 = arith.constant 0 : index
    %55 = vector.load %arg8[%c2_63, %c2_64, %c0_65] : memref<18x18x8xf32, #tpu.memory_space<vmem>>, vector<16x16x8xf32>
    %56 = vector.shape_cast %55 : vector<16x16x8xf32> to vector<256x8xf32>
    %c8 = arith.constant 8 : index
    %c0_66 = arith.constant 0 : index
    %c0_67 = arith.constant 0 : index
    %57 = vector.load %arg5[%c8, %c0_66, %c0_67] : memref<9x8x128xf32, #tpu.memory_space<vmem>>, vector<1x8x128xf32>
    %58 = vector.shape_cast %57 : vector<1x8x128xf32> to vector<8x128xf32>
    %cst_68 = arith.constant dense<0.000000e+00> : vector<256x128xf32>
    %59 = tpu.matmul %56, %58, %cst_68 {dimension_numbers = #tpu.dot_dimension_numbers<[1], [0], [0], [1], [0, 0, 1, 1], [], []>} : vector<256x8xf32>, vector<8x128xf32>, vector<256x128xf32> -> vector<256x128xf32>
    %60 = arith.addf %54, %59 : vector<256x128xf32>
    %c0_69 = arith.constant 0 : index
    %c0_70 = arith.constant 0 : index
    %61 = vector.load %arg6[%c0_69, %c0_70] : memref<1x128xf32, #tpu.memory_space<vmem>>, vector<1x128xf32>
    %62 = vector.broadcast %61 : vector<1x128xf32> to vector<256x128xf32>
    %63 = arith.addf %60, %62 : vector<256x128xf32>
    %c0_71 = arith.constant 0 : index
    %c0_72 = arith.constant 0 : index
    %c0_73 = arith.constant 0 : index
    %64 = vector.load %arg7[%c0_71, %c0_72, %c0_73] : memref<1x256x128xf32, #tpu.memory_space<vmem>>, vector<1x256x128xf32>
    %65 = vector.shape_cast %64 : vector<1x256x128xf32> to vector<256x128xf32>
    %66 = vector.shape_cast %63 : vector<256x128xf32> to vector<1x256x128xf32>
    tpu.vector_store %arg7[%c0_71, %c0_72, %c0_73], %66 {strides = array<i32>} : memref<1x256x128xf32, #tpu.memory_space<vmem>>, vector<1x256x128xf32>,
    return
  }
  func.func @transform_0(%arg0: i32, %arg1: i32, %arg2: i32) -> (i32, i32, i32, i32, i32) {
    %c0_i32 = arith.constant 0 : i32
    %c0_i32_0 = arith.constant 0 : i32
    %c0_i32_1 = arith.constant 0 : i32
    %c0_i32_2 = arith.constant 0 : i32
    return %arg0, %arg2, %c0_i32, %c0_i32_0, %c0_i32_1 : i32, i32, i32, i32, i32
  }
  func.func @transform_1(%arg0: i32, %arg1: i32, %arg2: i32) -> (i32, i32, i32, i32, i32) {
    %c1_i32 = arith.constant 1 : i32
    %0 = arith.addi %arg2, %c1_i32 : i32
    %c0_i32 = arith.constant 0 : i32
    %c0_i32_0 = arith.constant 0 : i32
    %c0_i32_1 = arith.constant 0 : i32
    %c0_i32_2 = arith.constant 0 : i32
    return %arg0, %0, %c0_i32, %c0_i32_0, %c0_i32_1 : i32, i32, i32, i32, i32
  }
  func.func @transform_2(%arg0: i32, %arg1: i32, %arg2: i32) -> (i32, i32, i32) {
    %c0_i32 = arith.constant 0 : i32
    %c0_i32_0 = arith.constant 0 : i32
    %c0_i32_1 = arith.constant 0 : i32
    return %c0_i32, %c0_i32_0, %arg1 : i32, i32, i32
  }
  func.func @transform_3(%arg0: i32, %arg1: i32, %arg2: i32) -> (i32, i32) {
    %c0_i32 = arith.constant 0 : i32
    %c0_i32_0 = arith.constant 0 : i32
    return %c0_i32, %arg1 : i32, i32
  }
  func.func @transform_4(%arg0: i32, %arg1: i32, %arg2: i32) -> (i32, i32, i32) {
    %c0_i32 = arith.constant 0 : i32
    return %arg0, %arg2, %arg1 : i32, i32, i32
  }
}

</mosaic_0001>

<bundles_post_ra>
// kernel: tpu_custom_call.1
= control target key start
LH: loop header
LB: loop body
LE: loop exit
PB: predicated region body
PF: predicated region fallthrough
CT: control target
= control target key end

     0   :  { %9 = vsyncpa [#allocation4], 0  ;;  %s4757_s0 = inlined_call_operand.vmem [shape: f32[2,2,16,18,8], index: 0, kind: input, shape index: {}]   ;;  %s4758_s1 = inlined_call_operand.vmem [shape: f32[2,2,16,18,8], index: 1, kind: input, shape index: {}]   ;;  %s4759_s2 = inlined_call_operand.vmem [shape: f32[9,8,128], index: 2, kind: input, shape index: {}]   ;;  %s4760_s3 = inlined_call_operand.vmem [shape: f32[1,128], index: 3, kind: input, shape index: {}]   ;;  %s4761_s4 = inlined_call_operand.hbm [shape: f32[2,256,128], index: 4, kind: output, shape index: {}]  }
   0x1   :  { %11 = vsyncpa [#allocation4 + $0x1], 0  ;;  %s3535_s15 = smov 0   ;;  %s3537_s16 = smov 0  }
   0x2   :  { %s3539_s17 = smov 0   ;;  %s3541_s18 = smov 0  }
   0x3   :  { %s3543_s19 = smov 0   ;;  %s3545_s20 = smov 0  }
   0x4 LB: > { %s3050_s21 = sadd.s32 4294967295, %s3506_s20   ;;  %s3051_s22 = sadd.s32 4294967294, %s3506_s20   ;;  %s3506_s20 = sphi %s3545_s20, %s17_s20   ;;  %s3502_s19 = sphi %s3543_s19, %s4880_s19   ;;  %s3498_s18 = sphi %s3541_s18, %s4879_s18   ;;  %s3494_s17 = sphi %s3539_s17, %s4878_s17   ;;  %s3490_s16 = sphi %s3537_s16, %s4877_s16   ;;  %s3486_s15 = sphi %s3535_s15, %s4876_s15  }
   0x5   : > { %s36_s23 = sadd.s32 1, %s3502_s19  ;;  %s157_s24 = sadd.s32 1, %s3494_s17 }
   0x6   : > { %p38_p0 = scmp.ge.s32.totalorder %s36_s23, 2  ;;  %p167_p1 = scmp.ne.s32.totalorder %s3494_s17, %s3490_s16 }
   0x7   : > { %p168_p2 = scmp.eq.s32.totalorder %s3050_s21, 1  ;;  %p173_p3 = scmp.ne.s32.totalorder %s3490_s16, %s3486_s15 }
   0x8   : > { %s4882_s23 = smov (%p38_p0, %s36_s23), 0  ;;  %p174_p5 = scmp.eq.s32.totalorder %s3051_s22, 1 }
   0x9   : > { %p3575_p4 = por %p168_p2, %p167_p1  ;;  %s150_s26 = ssub.s32 %s3502_s19, %s4882_s23 }
   0xa   : > { %p3056_p6 = scmp.ge.s32.totalorder %s3506_s20, 1  ;;  %p155_p7 = scmp.eq.s32.totalorder %s150_s26, 0 }
   0xb   : > { %p3582_p8 = por %p174_p5, %p173_p3  ;;  %p231_p9 = scmp.lt.s32.totalorder %s3506_s20, 3 }
   0xc   : > { %s3588_s28 = scalar_select %p155_p7, %s3494_s17, %s157_s24  }
   0xd   : > { %p232_p10 = pnand %p3056_p6, %p231_p9 }
   0xf   : > { %235 = sbr.rel (%p232_p10) target bundleno = 751 (0x2ef), region = 36 }
  0x14   : > { %v3060_v0 = vld [vmem:[%s4759_s2 + $0x8] sm:$0xff]  ;;  %p278_p11 = scmp.lt.s32.totalorder %s3498_s18, 1  ;;  %v3125_v1 = vld [vmem:[%s4759_s2 + $0x10] sm:$0xff]  ;;  %v3158_v2 = vld [vmem:[%s4759_s2 + $0x18] sm:$0xff]  ;;  %vm354_vm0 = vcmask 64512   ;;  %vm357_vm1 = vcmask 58368  }
  0x15   : > { %3364 = vmatpush.msra.mxu1 %v3060_v0  ;;  %3365 = vmatpush.msra.mxu2 %v3060_v0  ;;  %v449_v3 = vld [vmem:[%s4759_s2] sm:$0xff]  ;;  %s3363_s29 = sshll.u32 %s3498_s18, 8 }
  0x16   : > { %s3604_s11 = scalar_select %p278_p11, %s3498_s18, 1  ;;  %3366 = vmatpush.msra.mxu3 %v3060_v0  ;;  %v3191_v4 = vld [vmem:[%s4759_s2 + $0x20] sm:$0xff]  ;;  %595 = vmatpush.msra.mxu0 %v3060_v0 }
  0x17   : > { %1047 = vmatpush.msrb.mxu2 %v3125_v1  ;;  %804 = vmatpush.msrb.mxu1 %v449_v3  ;;  %s2912_s6 = scalar_lea.hbm %s4761_s4, %s3363_s29 }
  0x18   : > { %1323 = vmatpush.msrb.mxu3 %v3158_v2  ;;  %s3367_s14 = smul.u32 768, %s3604_s11  ;;  %1598 = vmatpush.msrb.mxu0 %v3191_v4  ;;  %s275_s11 = sand.u32 1, %s3490_s16  }
  0x19   : > { %s2915_s8 = sshll.u32 %s2912_s6, 4  ;;  %s2898_s18 = scalar_lea.sflag [#allocation4], %s275_s11  ;;  %s2916_s8 = int_to_ptr.hbm [resolvable:$true] %s2915_s8 }
  0x1a   : > { %s3615_s24 = scalar_lea.vmem %s4757_s0, %s3367_s14  ;;  %s3362_s10 = sadd.s32 384, %s3367_s14 }
  0x1b   : > { %v318_v5 = vld [vmem:[%s3615_s24 + $0x60] sm:$0xff]  ;;  %v319_v6 = vld [vmem:[%s3615_s24 + $0x68] sm:$0xff]  ;;  %v320_v11 = vld [vmem:[%s3615_s24 + $0x70] sm:$0x3]  ;;  %s4229_s21 = scalar_lea.vmem %s4758_s1, %s3362_s10  ;;  %s3057_s14 = sshll.u32 %s275_s11, 8 }
  0x1c   : > { %v330_v7 = vld [vmem:[%s3615_s24 + $0xc0] sm:$0xff]  ;;  %368 = vst.msk [vmem:[#allocation2 + $0x60] sm:$0xff] %vm354_vm0, %v318_v5  ;;  %v331_v8 = vld [vmem:[%s3615_s24 + $0xc8] sm:$0xff]  ;;  %v332_v12 = vld [vmem:[%s3615_s24 + $0xd0] sm:$0x3]  ;;  %s4527_s26 = scalar_lea.vmem [#allocation3], %s3057_s14 }
  0x1d   : > { %369 = vst.msk [vmem:[#allocation2 + $0x68] sm:$0xff] %vm354_vm0, %v319_v6  ;;  %v342_v9 = vld [vmem:[%s3615_s24 + $0x120] sm:$0xff]  ;;  %v343_v10 = vld [vmem:[%s3615_s24 + $0x128] sm:$0xff]  ;;  %v344_v15 = vld [vmem:[%s3615_s24 + $0x130] sm:$0x3]  ;;  %s2913_s7 = sshll.u32 %s4527_s26, 4  ;;  %s2914_s7 = int_to_ptr.vmem [resolvable:$true] %s2913_s7 }
  0x1e   : > { %380 = vst.msk [vmem:[#allocation2 + $0xc0] sm:$0xff] %vm354_vm0, %v330_v7  ;;  %v306_v13 = vld [vmem:[%s3615_s24] sm:$0xff]  ;;  %v307_v14 = vld [vmem:[%s3615_s24 + $0x8] sm:$0xff]  ;;  %v321_v17 = vld [vmem:[%s3615_s24 + $0x78] sm:$0xff]  ;;  %s3442_s9 = sshra.s32 %s2916_s8, 4  ;;  %s3443_s9 = int_to_ptr.hbm [resolvable:$true] %s3442_s9 }
  0x1f   : > { %381 = vst.msk [vmem:[#allocation2 + $0xc8] sm:$0xff] %vm354_vm0, %v331_v8  ;;  %v322_v18 = vld [vmem:[%s3615_s24 + $0x80] sm:$0xff]  ;;  %v333_v20 = vld [vmem:[%s3615_s24 + $0xd8] sm:$0xff]  ;;  %v308_v23 = vld [vmem:[%s3615_s24 + $0x10] sm:$0x3]  ;;  %s3444_s10 = scalar_lea.hbm %s3443_s9, 256  ;;  %p3449_p1 = scmp.lt.s32.totalorder %s3443_s9, %s4761_s4 }
  0x20   : > { %392 = vst.msk [vmem:[#allocation2 + $0x120] sm:$0xff] %vm354_vm0, %v342_v9  ;;  %v334_v21 = vld [vmem:[%s3615_s24 + $0xe0] sm:$0xff]  ;;  %v345_v24 = vld [vmem:[%s3615_s24 + $0x138] sm:$0xff]  ;;  %v323_v27 = vld [vmem:[%s3615_s24 + $0x88] sm:$0x3]  ;;  %p3445_p12 = scmp.ne.s32.totalorder %s3443_s9, %s3444_s10 }
  0x21   : > { %393 = vst.msk [vmem:[#allocation2 + $0x128] sm:$0xff] %vm354_vm0, %v343_v10  ;;  %v346_v26 = vld [vmem:[%s3615_s24 + $0x140] sm:$0xff]  ;;  %v335_v30 = vld [vmem:[%s3615_s24 + $0xe8] sm:$0x3]  ;;  %v309_v31 = vld [vmem:[%s3615_s24 + $0x18] sm:$0xff] }
  0x22   : > { %370 = vst.msk [vmem:[#allocation2 + $0x70] sm:$0x3] %vm357_vm1, %v320_v11  ;;  %v310_v33 = vld [vmem:[%s3615_s24 + $0x20] sm:$0xff]  ;;  %v347_v34 = vld [vmem:[%s3615_s24 + $0x148] sm:$0x3]  ;;  %v324_v35 = vld [vmem:[%s3615_s24 + $0x90] sm:$0xff]  ;;  %p3446_p13 = pnand %p3445_p12, %p3575_p4 }
  0x23   : > { %382 = vst.msk [vmem:[#allocation2 + $0xd0] sm:$0x3] %vm357_vm1, %v332_v12  ;;  %v325_v36 = vld [vmem:[%s3615_s24 + $0x98] sm:$0xff]  ;;  %v336_v39 = vld [vmem:[%s3615_s24 + $0xf0] sm:$0xff]  ;;  %v311_v42 = vld [vmem:[%s3615_s24 + $0x28] sm:$0x3] }
  0x24   : > { %v3636_v16 = vld [vmem:[#allocation2 + $0x61] sm:$0xff]  ;;  %355 = vst.msk [vmem:[#allocation2] sm:$0xff] %vm354_vm0, %v306_v13  ;;  %v337_v40 = vld [vmem:[%s3615_s24 + $0xf8] sm:$0xff]  ;;  %v348_v43 = vld [vmem:[%s3615_s24 + $0x150] sm:$0xff]  ;;  %p3447_p0 = pneg %p3446_p13 }
  0x25   : > { %3069 = vmatmul.msk.f32.vlgmr.msra.gmra.mxu1 %vm354_vm0, %v3636_v16  ;;  %356 = vst.msk [vmem:[#allocation2 + $0x8] sm:$0xff] %vm354_vm0, %v307_v14  ;;  %v349_v45 = vld [vmem:[%s3615_s24 + $0x158] sm:$0xff]  ;;  %v326_v46 = vld [vmem:[%s3615_s24 + $0xa0] sm:$0x3]  ;;  %v312_v48 = vld [vmem:[%s3615_s24 + $0x30] sm:$0xff] }
  0x26   : > { %v3644_v19 = vld [vmem:[#allocation2 + $0xc1] sm:$0xff]  ;;  %394 = vst.msk [vmem:[#allocation2 + $0x130] sm:$0x3] %vm357_vm1, %v344_v15  ;;  %v313_v51 = vld [vmem:[%s3615_s24 + $0x38] sm:$0xff]  ;;  %v328_v55 = vld [vmem:[%s3615_s24 + $0xb0] sm:$0xff] }
  0x27   : > { %3077 = vmatmul.msk.f32.vlgmr.msra.gmra.mxu2 %vm354_vm0, %v3644_v19  ;;  %371 = vst.msk [vmem:[#allocation2 + $0x78] sm:$0xff] %vm354_vm0, %v321_v17  ;;  %v338_v47 = vld [vmem:[%s3615_s24 + $0x100] sm:$0x3]  ;;  %v327_v54 = vld [vmem:[%s3615_s24 + $0xa8] sm:$0xff]  ;;  %v340_v58 = vld [vmem:[%s3615_s24 + $0x110] sm:$0xff] }
  0x28   : > { %v3652_v22 = vld [vmem:[#allocation2 + $0x121] sm:$0xff]  ;;  %372 = vst.msk [vmem:[#allocation2 + $0x80] sm:$0xff] %vm354_vm0, %v322_v18  ;;  %v352_v63 = vld [vmem:[%s3615_s24 + $0x170] sm:$0xff]  ;;  %v329_v0 = vld [vmem:[%s3615_s24 + $0xb8] sm:$0x3] }
  0x29   : > { %3085 = vmatmul.msk.f32.vlgmr.msra.gmra.mxu3 %vm354_vm0, %v3652_v22  ;;  %383 = vst.msk [vmem:[#allocation2 + $0xd8] sm:$0xff] %vm354_vm0, %v333_v20  ;;  %v3660_v25 = vld [vmem:[#allocation2 + $0x69] sm:$0xff]  ;;  %v350_v52 = vld [vmem:[%s3615_s24 + $0x160] sm:$0x3]  ;;  %v341_v2 = vld [vmem:[%s3615_s24 + $0x118] sm:$0x3] }
  0x2a   : > { %384 = vst.msk [vmem:[#allocation2 + $0xe0] sm:$0xff] %vm354_vm0, %v334_v21  ;;  %v3666_v28 = vld [vmem:[#allocation2 + $0xc9] sm:$0xff]  ;;  %v314_v59 = vld [vmem:[%s3615_s24 + $0x40] sm:$0x3]  ;;  %v353_v6 = vld [vmem:[%s3615_s24 + $0x178] sm:$0x3] }
  0x2b   : > { %358 = vst.msk [vmem:[#allocation2 + $0x10] sm:$0x3] %vm357_vm1, %v308_v23  ;;  %v339_v57 = vld [vmem:[%s3615_s24 + $0x108] sm:$0xff]  ;;  %v316_v5 = vld [vmem:[%s3615_s24 + $0x50] sm:$0xff]  ;;  %v317_v8 = vld [vmem:[%s3615_s24 + $0x58] sm:$0x3] }
  0x2c   : > { %v450_v29 = vld [vmem:[#allocation2 + $0x1] sm:$0xff]  ;;  %395 = vst.msk [vmem:[#allocation2 + $0x138] sm:$0xff] %vm354_vm0, %v345_v24  ;;  %v3257_v7 = vld [vmem:[%s4759_s2 + $0x30] sm:$0xff]  ;;  %v3290_v9 = vld [vmem:[%s4759_s2 + $0x38] sm:$0xff] }
  0x2d   : > { %3070 = vmatmul.msk.f32.gmra.mxu1 %vm354_vm0, %v3660_v25  ;;  %3061 = vmatmul.msk.f32.vlgmr.msra.gmra.mxu0 %vm354_vm0, %v450_v29  ;;  %396 = vst.msk [vmem:[#allocation2 + $0x140] sm:$0xff] %vm354_vm0, %v346_v26  ;;  %v3675_v32 = vld [vmem:[#allocation2 + $0x129] sm:$0xff]  ;;  %v3323_v15 = vld [vmem:[%s4759_s2 + $0x40] sm:$0xff] }
  0x2e   : > { %373 = vst.msk [vmem:[#allocation2 + $0x88] sm:$0x3] %vm357_vm1, %v323_v27  ;;  %v351_v60 = vld [vmem:[%s3615_s24 + $0x168] sm:$0xff]  ;;  %2149 = vmatpush.msra.mxu2 %v3257_v7  ;;  %2424 = vmatpush.msra.mxu3 %v3290_v9  ;;  %v417_v29 = vld [vmem:[#allocation2] sm:$0xff] }
  0x2f   : > { %3078 = vmatmul.msk.f32.gmra.mxu2 %vm354_vm0, %v3666_v28  ;;  %385 = vst.msk [vmem:[#allocation2 + $0xe8] sm:$0x3] %vm357_vm1, %v335_v30  ;;  %v3689_v37 = vld [vmem:[#allocation2 + $0x79] sm:$0xff]  ;;  %v315_v3 = vld [vmem:[%s3615_s24 + $0x48] sm:$0xff]  ;;  %2699 = vmatpush.msra.mxu0 %v3323_v15 }
  0x30   : > { %359 = vst.msk [vmem:[#allocation2 + $0x18] sm:$0xff] %vm354_vm0, %v309_v31  ;;  %v3224_v10 = vld [vmem:[%s4759_s2 + $0x28] sm:$0xff] }
  0x31   : > { %3086 = vmatmul.msk.f32.gmra.mxu3 %vm354_vm0, %v3675_v32  ;;  %360 = vst.msk [vmem:[#allocation2 + $0x20] sm:$0xff] %vm354_vm0, %v310_v33  ;;  %v3695_v41 = vld [vmem:[#allocation2 + $0xd9] sm:$0xff]  ;;  %1873 = vmatpush.msra.mxu1 %v3224_v10  ;;  %v902_v31 = vld [vmem:[#allocation2 + $0x2] sm:$0xff] }
  0x32   : > { %v451_v38 = vld [vmem:[#allocation2 + $0x9] sm:$0xff]  ;;  %397 = vst.msk [vmem:[#allocation2 + $0x148] sm:$0x3] %vm357_vm1, %v347_v34 }
  0x33   : > { %374 = vst.msk [vmem:[#allocation2 + $0x90] sm:$0xff] %vm354_vm0, %v324_v35  ;;  %v418_v34 = vld [vmem:[#allocation2 + $0x8] sm:$0xff] }
  0x34   : > { %375 = vst.msk [vmem:[#allocation2 + $0x98] sm:$0xff] %vm354_vm0, %v325_v36  ;;  %v3704_v44 = vld [vmem:[#allocation2 + $0x139] sm:$0xff]  ;;  %v903_v35 = vld [vmem:[#allocation2 + $0xa] sm:$0xff] }
  0x35   : > { %3071 = vmatmul.msk.f32.gmra.mxu1 %vm354_vm0, %v3689_v37  ;;  %3062 = vmatmul.msk.f32.gmra.mxu0 %vm354_vm0, %v451_v38  ;;  %386 = vst.msk [vmem:[#allocation2 + $0xf0] sm:$0xff] %vm354_vm0, %v336_v39  ;;  %v3718_v49 = vld [vmem:[#allocation2 + $0x81] sm:$0xff] }
  0x36   : > { %387 = vst.msk [vmem:[#allocation2 + $0xf8] sm:$0xff] %vm354_vm0, %v337_v40  ;;  %v3726_v53 = vld [vmem:[#allocation2 + $0xe1] sm:$0xff] }
  0x37   : > { %3079 = vmatmul.msk.f32.gmra.mxu2 %vm354_vm0, %v3695_v41  ;;  %361 = vst.msk [vmem:[#allocation2 + $0x28] sm:$0x3] %vm357_vm1, %v311_v42  ;;  %v1178_v33 = vld [vmem:[#allocation2 + $0x18] sm:$0xff]  ;;  %v3987_v10 = vld [vmem:[#allocation2 + $0x82] sm:$0xff] }
  0x38   : > { %398 = vst.msk [vmem:[#allocation2 + $0x150] sm:$0xff] %vm354_vm0, %v348_v43  ;;  %v3720_v50 = vld [vmem:[#allocation2 + $0x19] sm:$0xff] }
  0x39   : > { %3087 = vmatmul.msk.f32.gmra.mxu3 %vm354_vm0, %v3704_v44  ;;  %399 = vst.msk [vmem:[#allocation2 + $0x158] sm:$0xff] %vm354_vm0, %v349_v45  ;;  %v3736_v56 = vld [vmem:[#allocation2 + $0x141] sm:$0xff] }
  0x3a   : > { %376 = vst.msk [vmem:[#allocation2 + $0xa0] sm:$0x3] %vm357_vm1, %v326_v46  ;;  %v1179_v36 = vld [vmem:[#allocation2 + $0x20] sm:$0xff] }
  0x3b   : > { %388 = vst.msk [vmem:[#allocation2 + $0x100] sm:$0x3] %vm357_vm1, %v338_v47  ;;  %v3750_v61 = vld [vmem:[#allocation2 + $0x91] sm:$0xff]  ;;  %v3855_v38 = vld [vmem:[#allocation2 + $0x1a] sm:$0xff] }
  0x3c   : > { %362 = vst.msk [vmem:[#allocation2 + $0x30] sm:$0xff] %vm354_vm0, %v312_v48 }
  0x3d   : > { %3072 = vmatmul.msk.f32.gmra.mxu1 %vm354_vm0, %v3718_v49  ;;  %3063 = vmatmul.msk.f32.gmra.mxu0 %vm354_vm0, %v3720_v50  ;;  %363 = vst.msk [vmem:[#allocation2 + $0x38] sm:$0xff] %vm354_vm0, %v313_v51  ;;  %v3758_v1 = vld [vmem:[#allocation2 + $0xf1] sm:$0xff] }
  0x3e   : > { %400 = vst.msk [vmem:[#allocation2 + $0x160] sm:$0x3] %vm357_vm1, %v350_v52  ;;  %v3752_v62 = vld [vmem:[#allocation2 + $0x21] sm:$0xff] }
  0x3f   : > { %3080 = vmatmul.msk.f32.gmra.mxu2 %vm354_vm0, %v3726_v53  ;;  %377 = vst.msk [vmem:[#allocation2 + $0xa8] sm:$0xff] %vm354_vm0, %v327_v54  ;;  %v3866_v40 = vld [vmem:[#allocation2 + $0x22] sm:$0xff] }
  0x40   : > { %378 = vst.msk [vmem:[#allocation2 + $0xb0] sm:$0xff] %vm354_vm0, %v328_v55  ;;  %v3768_v4 = vld [vmem:[#allocation2 + $0x151] sm:$0xff]  ;;  %v3919_v52 = vld [vmem:[#allocation2 + $0x68] sm:$0xff] }
  0x41   : > { %3088 = vmatmul.msk.f32.gmra.mxu3 %vm354_vm0, %v3736_v56  ;;  %389 = vst.msk [vmem:[#allocation2 + $0x108] sm:$0xff] %vm354_vm0, %v339_v57  ;;  %v3790_v11 = vld [vmem:[#allocation2 + $0x99] sm:$0xff]  ;;  %v3927_v55 = vld [vmem:[#allocation2 + $0x62] sm:$0xff] }
  0x42   : > { %390 = vst.msk [vmem:[#allocation2 + $0x110] sm:$0xff] %vm354_vm0, %v340_v58  ;;  %v3796_v13 = vld [vmem:[#allocation2 + $0xf9] sm:$0xff] }
  0x43   : > { %364 = vst.msk [vmem:[#allocation2 + $0x40] sm:$0x3] %vm357_vm1, %v314_v59  ;;  %v3860_v39 = vld [vmem:[#allocation2 + $0x30] sm:$0xff]  ;;  %v3933_v57 = vld [vmem:[#allocation2 + $0x78] sm:$0xff] }
  0x44   : > { %401 = vst.msk [vmem:[#allocation2 + $0x168] sm:$0xff] %vm354_vm0, %v351_v60  ;;  %v3792_v12 = vld [vmem:[#allocation2 + $0x31] sm:$0xff] }
  0x45   : > { %3073 = vmatmul.msk.f32.gmra.mxu1 %vm354_vm0, %v3750_v61  ;;  %3064 = vmatmul.msk.f32.gmra.mxu0 %vm354_vm0, %v3752_v62  ;;  %402 = vst.msk [vmem:[#allocation2 + $0x170] sm:$0xff] %vm354_vm0, %v352_v63  ;;  %v3802_v14 = vld [vmem:[#allocation2 + $0x159] sm:$0xff] }
  0x46   : > { %379 = vst.msk [vmem:[#allocation2 + $0xb8] sm:$0x3] %vm357_vm1, %v329_v0  ;;  %v3871_v42 = vld [vmem:[#allocation2 + $0x38] sm:$0xff] }
  0x47   : > { %3081 = vmatmul.msk.f32.gmra.mxu2 %vm354_vm0, %v3758_v1  ;;  %391 = vst.msk [vmem:[#allocation2 + $0x118] sm:$0x3] %vm357_vm1, %v341_v2  ;;  %v3811_v17 = vld [vmem:[#allocation2 + $0xa9] sm:$0xff]  ;;  %v3877_v43 = vld [vmem:[#allocation2 + $0x32] sm:$0xff] }
  0x48   : > { %365 = vst.msk [vmem:[#allocation2 + $0x48] sm:$0xff] %vm354_vm0, %v315_v3 }
  0x49   : > { %3089 = vmatmul.msk.f32.gmra.mxu3 %vm354_vm0, %v3768_v4  ;;  %366 = vst.msk [vmem:[#allocation2 + $0x50] sm:$0xff] %vm354_vm0, %v316_v5  ;;  %v3815_v20 = vld [vmem:[#allocation2 + $0x109] sm:$0xff]  ;;  %v3967_v5 = vld [vmem:[#allocation2 + $0x7a] sm:$0xff] }
  0x4a   : > { %403 = vst.msk [vmem:[#allocation2 + $0x178] sm:$0x3] %vm357_vm1, %v353_v6  ;;  %v3813_v18 = vld [vmem:[#allocation2 + $0x39] sm:$0xff] }
  0x4b   : > { %367 = vst.msk [vmem:[#allocation2 + $0x58] sm:$0x3] %vm357_vm1, %v317_v8  ;;  %v3889_v46 = vld [vmem:[#allocation2 + $0x3a] sm:$0xff] }
  0x4c   : > { %v3821_v21 = vld [vmem:[#allocation2 + $0x169] sm:$0xff]  ;;  %4790 = vst [vmem:[#allocation6_spill] sm:$0xff] %v3919_v52 }
  0x4d   : > { %3074 = vmatmul.msk.f32.gmra.mxu1 %vm354_vm0, %v3790_v11  ;;  %3065 = vmatmul.msk.f32.gmra.mxu0 %vm354_vm0, %v3792_v12  ;;  %v3827_v23 = vld [vmem:[#allocation2 + $0xb1] sm:$0xff]  ;;  %4791 = vst [vmem:[#allocation7_spill] sm:$0xff] %v3933_v57 }
  0x4e   : > { %v3831_v26 = vld [vmem:[#allocation2 + $0x111] sm:$0xff]  ;;  %4796 = vst [vmem:[#allocation12_spill] sm:$0xff] %v3967_v5 }
  0x4f   : > { %3082 = vmatmul.msk.f32.gmra.mxu2 %vm354_vm0, %v3796_v13  ;;  %v3883_v45 = vld [vmem:[#allocation2 + $0x48] sm:$0xff]  ;;  %4799 = vst [vmem:[#allocation15_spill] sm:$0xff] %v3987_v10 }
  0x50   : > { %v3829_v24 = vld [vmem:[#allocation2 + $0x49] sm:$0xff] }
  0x51   : > { %3090 = vmatmul.msk.f32.gmra.mxu3 %vm354_vm0, %v3802_v14  ;;  %v3837_v27 = vld [vmem:[#allocation2 + $0x171] sm:$0xff] }
  0x52   : > { %v3843_v30 = vld [vmem:[#allocation2 + $0x51] sm:$0xff] }
  0x53   : > { %v3895_v47 = vld [vmem:[#allocation2 + $0x50] sm:$0xff] }
  0x54   : > { %v3901_v48 = vld [vmem:[#allocation2 + $0x4a] sm:$0xff]  ;;  %v3913_v51 = vld [vmem:[#allocation2 + $0x52] sm:$0xff] }
  0x55   : > { %3075 = vmatmul.msk.f32.gmra.mxu1 %vm354_vm0, %v3811_v17  ;;  %3066 = vmatmul.msk.f32.gmra.mxu0 %vm354_vm0, %v3813_v18 }
  0x57   : > { %3083 = vmatmul.msk.f32.gmra.mxu2 %vm354_vm0, %v3815_v20 }
  0x59   : > { %3091 = vmatmul.msk.f32.gmra.mxu3 %vm354_vm0, %v3821_v21 }
  0x5d   : > { %3076 = vmatmul.msk.f32.gmra.mxu1 %vm354_vm0, %v3827_v23  ;;  %3067 = vmatmul.msk.f32.gmra.mxu0 %vm354_vm0, %v3829_v24 }
  0x5f   : > { %3084 = vmatmul.msk.f32.gmra.mxu2 %vm354_vm0, %v3831_v26 }
  0x61   : > { %3092 = vmatmul.msk.f32.gmra.mxu3 %vm354_vm0, %v3837_v27 }
  0x65   : > { %3093 = vmatmul.msk.f32.vlgmr.msrb.gmra.mxu1 %vm354_vm0, %v417_v29  ;;  %3068 = vmatmul.msk.f32.gmra.mxu0 %vm354_vm0, %v3843_v30 }
  0x67   : > { %3126 = vmatmul.msk.f32.vlgmr.msrb.gmra.mxu2 %vm354_vm0, %v902_v31 }
  0x69   : > { %3159 = vmatmul.msk.f32.vlgmr.msrb.gmra.mxu3 %vm354_vm0, %v1178_v33 }
  0x6d   : > { %3094 = vmatmul.msk.f32.gmra.mxu1 %vm354_vm0, %v418_v34  ;;  %3192 = vmatmul.msk.f32.vlgmr.msrb.gmra.mxu0 %vm354_vm0, %v3720_v50  ;;  %v3907_v50 = vld [vmem:[#allocation2 + $0x60] sm:$0xff]  ;;  %v4007_v34 = vld [vmem:[#allocation2 + $0x92] sm:$0xff] }
  0x6e   : > { %4802 = vst [vmem:[#allocation18_spill] sm:$0xff] %v4007_v34 }
  0x6f   : > { %3127 = vmatmul.msk.f32.gmra.mxu2 %vm354_vm0, %v903_v35 }
  0x71   : > { %3160 = vmatmul.msk.f32.gmra.mxu3 %vm354_vm0, %v1179_v36 }
  0x75   : > { %3095 = vmatmul.msk.f32.gmra.mxu1 %vm354_vm0, %v1178_v33  ;;  %3193 = vmatmul.msk.f32.gmra.mxu0 %vm354_vm0, %v3752_v62  ;;  %v3947_v62 = vld [vmem:[#allocation2 + $0x6a] sm:$0xff] }
  0x76   : > { %4793 = vst [vmem:[#allocation9_spill] sm:$0xff] %v3947_v62 }
  0x77   : > { %3128 = vmatmul.msk.f32.gmra.mxu2 %vm354_vm0, %v3855_v38 }
  0x79   : > { %3161 = vmatmul.msk.f32.gmra.mxu3 %vm354_vm0, %v3860_v39 }
  0x7d   : > { %3096 = vmatmul.msk.f32.gmra.mxu1 %vm354_vm0, %v1179_v36  ;;  %3194 = vmatmul.msk.f32.gmra.mxu0 %vm354_vm0, %v3792_v12 }
  0x7f   : > { %3129 = vmatmul.msk.f32.gmra.mxu2 %vm354_vm0, %v3866_v40 }
  0x81   : > { %3162 = vmatmul.msk.f32.gmra.mxu3 %vm354_vm0, %v3871_v42 }
  0x85   : > { %3097 = vmatmul.msk.f32.gmra.mxu1 %vm354_vm0, %v3860_v39  ;;  %3195 = vmatmul.msk.f32.gmra.mxu0 %vm354_vm0, %v3813_v18 }
  0x87   : > { %3130 = vmatmul.msk.f32.gmra.mxu2 %vm354_vm0, %v3877_v43 }
  0x89   : > { %3163 = vmatmul.msk.f32.gmra.mxu3 %vm354_vm0, %v3883_v45 }
  0x8d   : > { %3098 = vmatmul.msk.f32.gmra.mxu1 %vm354_vm0, %v3871_v42  ;;  %3196 = vmatmul.msk.f32.gmra.mxu0 %vm354_vm0, %v3829_v24 }
  0x8f   : > { %3131 = vmatmul.msk.f32.gmra.mxu2 %vm354_vm0, %v3889_v46 }
  0x91   : > { %3164 = vmatmul.msk.f32.gmra.mxu3 %vm354_vm0, %v3895_v47 }
  0x95   : > { %3099 = vmatmul.msk.f32.gmra.mxu1 %vm354_vm0, %v3883_v45  ;;  %3197 = vmatmul.msk.f32.gmra.mxu0 %vm354_vm0, %v3843_v30 }
  0x97   : > { %3132 = vmatmul.msk.f32.gmra.mxu2 %vm354_vm0, %v3901_v48 }
  0x99   : > { %3165 = vmatmul.msk.f32.gmra.mxu3 %vm354_vm0, %v3907_v50 }
  0x9d   : > { %3100 = vmatmul.msk.f32.gmra.mxu1 %vm354_vm0, %v3895_v47  ;;  %3198 = vmatmul.msk.f32.gmra.mxu0 %vm354_vm0, %v3636_v16 }
  0x9f   : > { %3133 = vmatmul.msk.f32.gmra.mxu2 %vm354_vm0, %v3913_v51 }
  0xa1   : > { %3166 = vmatmul.msk.f32.gmra.mxu3 %vm354_vm0, %v3919_v52 }
  0xa2   : > { %v3925_v54 = vpop.f32.mrf.mxu1 }
  0xa5   : > { %3101 = vmatmul.msk.f32.gmra.mxu1 %vm354_vm0, %v3907_v50  ;;  %3199 = vmatmul.msk.f32.gmra.mxu0 %vm354_vm0, %v3660_v25  ;;  %v3953_v25 = vld [vmem:[#allocation2 + $0x80] sm:$0xff] }
  0xa6   : > { %4794 = vst [vmem:[#allocation10_spill] sm:$0xff] %v3953_v25 }
  0xa7   : > { %3134 = vmatmul.msk.f32.gmra.mxu2 %vm354_vm0, %v3927_v55 }
  0xa9   : > { %3167 = vmatmul.msk.f32.gmra.mxu3 %vm354_vm0, %v3933_v57 }
  0xaa   : > { %v3939_v16 = vpop.f32.mrf.mxu2  ;;  %v3941_v58 = vpop.f32.mrf.mxu1 }
  0xab   : > { %v3943_v59 = vpop.f32.mrf.mxu0 }
  0xac   : > { %v3945_v60 = vpop.f32.mrf.mxu3 }
  0xad   : > { %4792 = vst [vmem:[#allocation8_spill] sm:$0xff] %v3945_v60  ;;  %3102 = vmatmul.msk.f32.gmra.mxu1 %vm354_vm0, %v3919_v52  ;;  %3200 = vmatmul.msk.f32.gmra.mxu0 %vm354_vm0, %v3689_v37  ;;  %v3973_v37 = vld [vmem:[#allocation2 + $0x90] sm:$0xff] }
  0xae   : > { %4797 = vst [vmem:[#allocation13_spill] sm:$0xff] %v3973_v37  ;;  %v4098_v52 = vld [vmem:[#allocation2 + $0xca] sm:$0xff] }
  0xaf   : > { %3135 = vmatmul.msk.f32.gmra.mxu2 %vm354_vm0, %v3947_v62 }
  0xb1   : > { %3168 = vmatmul.msk.f32.gmra.mxu3 %vm354_vm0, %v3953_v25 }
  0xb2   : > { %v3959_v63 = vpop.f32.mrf.mxu2  ;;  %v3961_v0 = vpop.f32.mrf.mxu1 }
  0xb3   : > { %v3963_v2 = vpop.f32.mrf.mxu0 }
  0xb4   : > { %v3965_v3 = vpop.f32.mrf.mxu3 }
  0xb5   : > { %4795 = vst [vmem:[#allocation11_spill] sm:$0xff] %v3965_v3  ;;  %3103 = vmatmul.msk.f32.gmra.mxu1 %vm354_vm0, %v3933_v57  ;;  %3201 = vmatmul.msk.f32.gmra.mxu0 %vm354_vm0, %v3718_v49  ;;  %v3993_v49 = vld [vmem:[#allocation2 + $0x98] sm:$0xff]  ;;  %v4085_v57 = vld [vmem:[#allocation2 + $0xc2] sm:$0xff] }
  0xb6   : > { %4800 = vst [vmem:[#allocation16_spill] sm:$0xff] %v3993_v49  ;;  %v4027_v3 = vld [vmem:[#allocation2 + $0x9a] sm:$0xff] }
  0xb7   : > { %3136 = vmatmul.msk.f32.gmra.mxu2 %vm354_vm0, %v3967_v5  ;;  %4805 = vst [vmem:[#allocation21_spill] sm:$0xff] %v4027_v3 }
  0xb8   : > { %4817 = vst [vmem:[#allocation33_spill] sm:$0xff] %v4085_v57 }
  0xb9   : > { %3169 = vmatmul.msk.f32.gmra.mxu3 %vm354_vm0, %v3973_v37 }
  0xba   : > { %v3979_v6 = vpop.f32.mrf.mxu2  ;;  %v3981_v7 = vpop.f32.mrf.mxu1 }
  0xbb   : > { %v3983_v8 = vpop.f32.mrf.mxu0 }
  0xbc   : > { %v3985_v9 = vpop.f32.mrf.mxu3 }
  0xbd   : > { %4798 = vst [vmem:[#allocation14_spill] sm:$0xff] %v3985_v9  ;;  %3104 = vmatmul.msk.f32.gmra.mxu1 %vm354_vm0, %v3953_v25  ;;  %3202 = vmatmul.msk.f32.gmra.mxu0 %vm354_vm0, %v3750_v61  ;;  %v4013_v61 = vld [vmem:[#allocation2 + $0xa8] sm:$0xff] }
  0xbe   : > { %4803 = vst [vmem:[#allocation19_spill] sm:$0xff] %v4013_v61 }
  0xbf   : > { %3137 = vmatmul.msk.f32.gmra.mxu2 %vm354_vm0, %v3987_v10 }
  0xc1   : > { %3170 = vmatmul.msk.f32.gmra.mxu3 %vm354_vm0, %v3993_v49 }
  0xc2   : > { %v3999_v15 = vpop.f32.mrf.mxu2  ;;  %v4001_v29 = vpop.f32.mrf.mxu1 }
  0xc3   : > { %v4003_v31 = vpop.f32.mrf.mxu0 }
  0xc4   : > { %v4005_v33 = vpop.f32.mrf.mxu3 }
  0xc5   : > { %4801 = vst [vmem:[#allocation17_spill] sm:$0xff] %v4005_v33  ;;  %3105 = vmatmul.msk.f32.gmra.mxu1 %vm354_vm0, %v3973_v37  ;;  %3203 = vmatmul.msk.f32.gmra.mxu0 %vm354_vm0, %v3790_v11  ;;  %v4033_v11 = vld [vmem:[#allocation2 + $0xb0] sm:$0xff] }
  0xc6   : > { %4806 = vst [vmem:[#allocation22_spill] sm:$0xff] %v4033_v11 }
  0xc7   : > { %3138 = vmatmul.msk.f32.gmra.mxu2 %vm354_vm0, %v4007_v34 }
  0xc9   : > { %3171 = vmatmul.msk.f32.gmra.mxu3 %vm354_vm0, %v4013_v61 }
  0xca   : > { %v4019_v35 = vpop.f32.mrf.mxu2  ;;  %v4021_v36 = vpop.f32.mrf.mxu1 }
  0xcb   : > { %v4023_v33 = vpop.f32.mrf.mxu0 }
  0xcc   : > { %v4025_v9 = vpop.f32.mrf.mxu3 }
  0xcd   : > { %4804 = vst [vmem:[#allocation20_spill] sm:$0xff] %v4025_v9  ;;  %3106 = vmatmul.msk.f32.gmra.mxu1 %vm354_vm0, %v3993_v49  ;;  %3204 = vmatmul.msk.f32.gmra.mxu0 %vm354_vm0, %v3811_v17  ;;  %v4047_v49 = vld [vmem:[#allocation2 + $0xaa] sm:$0xff]  ;;  %v4053_v17 = vld [vmem:[#allocation2 + $0xc0] sm:$0xff] }
  0xce   : > { %4809 = vst [vmem:[#allocation25_spill] sm:$0xff] %v4047_v49 }
  0xcf   : > { %3139 = vmatmul.msk.f32.gmra.mxu2 %vm354_vm0, %v4027_v3  ;;  %4810 = vst [vmem:[#allocation26_spill] sm:$0xff] %v4053_v17 }
  0xd1   : > { %3172 = vmatmul.msk.f32.gmra.mxu3 %vm354_vm0, %v4033_v11 }
  0xd2   : > { %v4039_v34 = vpop.f32.mrf.mxu2  ;;  %v4041_v60 = vpop.f32.mrf.mxu1 }
  0xd3   : > { %4807 = vst [vmem:[#allocation23_spill] sm:$0xff] %v4039_v34  ;;  %v4043_v9 = vpop.f32.mrf.mxu0 }
  0xd4   : > { %v4045_v37 = vpop.f32.mrf.mxu3 }
  0xd5   : > { %4808 = vst [vmem:[#allocation24_spill] sm:$0xff] %v4045_v37  ;;  %3107 = vmatmul.msk.f32.gmra.mxu1 %vm354_vm0, %v4013_v61  ;;  %3205 = vmatmul.msk.f32.gmra.mxu0 %vm354_vm0, %v3827_v23  ;;  %v4067_v61 = vld [vmem:[#allocation2 + $0xb2] sm:$0xff]  ;;  %v4073_v23 = vld [vmem:[#allocation2 + $0xc8] sm:$0xff] }
  0xd6   : > { %4813 = vst [vmem:[#allocation29_spill] sm:$0xff] %v4067_v61 }
  0xd7   : > { %3140 = vmatmul.msk.f32.gmra.mxu2 %vm354_vm0, %v4047_v49  ;;  %4814 = vst [vmem:[#allocation30_spill] sm:$0xff] %v4073_v23 }
  0xd9   : > { %3173 = vmatmul.msk.f32.gmra.mxu3 %vm354_vm0, %v4053_v17 }
  0xda   : > { %v4059_v3 = vpop.f32.mrf.mxu2  ;;  %v4061_v10 = vpop.f32.mrf.mxu1 }
  0xdb   : > { %4811 = vst [vmem:[#allocation27_spill] sm:$0xff] %v4059_v3  ;;  %v4063_v37 = vpop.f32.mrf.mxu0 }
  0xdc   : > { %v4065_v25 = vpop.f32.mrf.mxu3 }
  0xdd   : > { %4812 = vst [vmem:[#allocation28_spill] sm:$0xff] %v4065_v25  ;;  %3108 = vmatmul.msk.f32.gmra.mxu1 %vm354_vm0, %v4033_v11  ;;  %3206 = vmatmul.msk.f32.gmra.mxu0 %vm354_vm0, %v3644_v19  ;;  %v4091_v19 = vld [vmem:[#allocation2 + $0xd8] sm:$0xff] }
  0xdf   : > { %3141 = vmatmul.msk.f32.gmra.mxu2 %vm354_vm0, %v4067_v61 }
  0xe1   : > { %3174 = vmatmul.msk.f32.gmra.mxu3 %vm354_vm0, %v4073_v23 }
  0xe2   : > { %v4079_v49 = vpop.f32.mrf.mxu2  ;;  %v806_v5 = vpop.f32.mrf.mxu1 }
  0xe3   : > { %4815 = vst [vmem:[#allocation31_spill] sm:$0xff] %v4079_v49  ;;  %v4081_v25 = vpop.f32.mrf.mxu0  ;;  %v807_v61 = vadd.f32 %v806_v5, %v3943_v59 }
  0xe4   : > { %v4083_v3 = vpop.f32.mrf.mxu3 }
  0xe5   : > { %4816 = vst [vmem:[#allocation32_spill] sm:$0xff] %v4083_v3  ;;  %3109 = vmatmul.msk.f32.gmra.mxu1 %vm354_vm0, %v4053_v17  ;;  %3207 = vmatmul.msk.f32.gmra.mxu0 %vm354_vm0, %v3666_v28  ;;  %v4104_v28 = vld [vmem:[#allocation2 + $0xe0] sm:$0xff] }
  0xe7   : > { %3142 = vmatmul.msk.f32.gmra.mxu2 %vm354_vm0, %v4085_v57  ;;  %v4113_v57 = vld [vmem:[#allocation2 + $0xda] sm:$0xff] }
  0xe9   : > { %3175 = vmatmul.msk.f32.gmra.mxu3 %vm354_vm0, %v4091_v19 }
  0xea   : > { %v1049_v11 = vpop.f32.mrf.mxu2  ;;  %v809_v3 = vpop.f32.mrf.mxu1 }
  0xeb   : > { %v1145_v49 = vadd.f32 %v1049_v11, %v807_v61  ;;  %v1600_v62 = vpop.f32.mrf.mxu0  ;;  %v810_v5 = vadd.f32 %v809_v3, %v3963_v2 }
  0xec   : > { %v1325_v34 = vpop.f32.mrf.mxu3 }
  0xed   : > { %v1421_v17 = vadd.f32 %v1325_v34, %v1145_v49  ;;  %3110 = vmatmul.msk.f32.gmra.mxu1 %vm354_vm0, %v4073_v23  ;;  %3208 = vmatmul.msk.f32.gmra.mxu0 %vm354_vm0, %v3695_v41 }
  0xef   : > { %v4106_v59 = vadd.f32 %v1600_v62, %v1421_v17  ;;  %3143 = vmatmul.msk.f32.gmra.mxu2 %vm354_vm0, %v4098_v52  ;;  %v4119_v62 = vld [vmem:[#allocation2 + $0xf0] sm:$0xff] }
  0xf1   : > { %4818 = vst [vmem:[#allocation34_spill] sm:$0xff] %v4106_v59  ;;  %3176 = vmatmul.msk.f32.gmra.mxu3 %vm354_vm0, %v4104_v28  ;;  %v4128_v59 = vld [vmem:[#allocation2 + $0xe2] sm:$0xff] }
  0xf2   : > { %v1052_v61 = vpop.f32.mrf.mxu2  ;;  %v812_v49 = vpop.f32.mrf.mxu1 }
  0xf3   : > { %v1146_v34 = vadd.f32 %v1052_v61, %v810_v5  ;;  %v1603_v11 = vpop.f32.mrf.mxu0  ;;  %v813_v3 = vadd.f32 %v812_v49, %v3983_v8 }
  0xf4   : > { %v1328_v23 = vpop.f32.mrf.mxu3 }
  0xf5   : > { %v1422_v41 = vadd.f32 %v1328_v23, %v1146_v34  ;;  %3111 = vmatmul.msk.f32.gmra.mxu1 %vm354_vm0, %v4091_v19  ;;  %3209 = vmatmul.msk.f32.gmra.mxu0 %vm354_vm0, %v3726_v53 }
  0xf7   : > { %v4121_v2 = vadd.f32 %v1603_v11, %v1422_v41  ;;  %3144 = vmatmul.msk.f32.gmra.mxu2 %vm354_vm0, %v4113_v57  ;;  %v4134_v11 = vld [vmem:[#allocation2 + $0xf8] sm:$0xff] }
  0xf9   : > { %4819 = vst [vmem:[#allocation35_spill] sm:$0xff] %v4121_v2  ;;  %3177 = vmatmul.msk.f32.gmra.mxu3 %vm354_vm0, %v4119_v62  ;;  %v4143_v2 = vld [vmem:[#allocation2 + $0xf2] sm:$0xff] }
  0xfa   : > { %v1055_v17 = vpop.f32.mrf.mxu2  ;;  %v815_v23 = vpop.f32.mrf.mxu1 }
  0xfb   : > { %v1147_v5 = vadd.f32 %v1055_v17, %v813_v3  ;;  %v1606_v61 = vpop.f32.mrf.mxu0  ;;  %v816_v49 = vadd.f32 %v815_v23, %v4003_v31 }
  0xfc   : > { %v1331_v34 = vpop.f32.mrf.mxu3 }
  0xfd   : > { %v1423_v53 = vadd.f32 %v1331_v34, %v1147_v5  ;;  %3112 = vmatmul.msk.f32.gmra.mxu1 %vm354_vm0, %v4104_v28  ;;  %3210 = vmatmul.msk.f32.gmra.mxu0 %vm354_vm0, %v3758_v1 }
  0xff   : > { %v4136_v8 = vadd.f32 %v1606_v61, %v1423_v53  ;;  %3145 = vmatmul.msk.f32.gmra.mxu2 %vm354_vm0, %v4128_v59  ;;  %v4149_v61 = vld [vmem:[#allocation2 + $0x108] sm:$0xff] }
 0x101   : > { %4820 = vst [vmem:[#allocation36_spill] sm:$0xff] %v4136_v8  ;;  %3178 = vmatmul.msk.f32.gmra.mxu3 %vm354_vm0, %v4134_v11  ;;  %v4158_v8 = vld [vmem:[#allocation2 + $0xfa] sm:$0xff] }
 0x102   : > { %v1058_v41 = vpop.f32.mrf.mxu2  ;;  %v818_v3 = vpop.f32.mrf.mxu1 }
 0x103   : > { %v1148_v17 = vadd.f32 %v1058_v41, %v816_v49  ;;  %v1609_v5 = vpop.f32.mrf.mxu0  ;;  %v819_v23 = vadd.f32 %v818_v3, %v4023_v33 }
 0x104   : > { %v1334_v34 = vpop.f32.mrf.mxu3 }
 0x105   : > { %v1424_v1 = vadd.f32 %v1334_v34, %v1148_v17  ;;  %3113 = vmatmul.msk.f32.gmra.mxu1 %vm354_vm0, %v4119_v62  ;;  %3211 = vmatmul.msk.f32.gmra.mxu0 %vm354_vm0, %v3796_v13 }
 0x107   : > { %v4151_v31 = vadd.f32 %v1609_v5, %v1424_v1  ;;  %3146 = vmatmul.msk.f32.gmra.mxu2 %vm354_vm0, %v4143_v2  ;;  %v4164_v5 = vld [vmem:[#allocation2 + $0x110] sm:$0xff] }
 0x109   : > { %4821 = vst [vmem:[#allocation37_spill] sm:$0xff] %v4151_v31  ;;  %3179 = vmatmul.msk.f32.gmra.mxu3 %vm354_vm0, %v4149_v61  ;;  %v4173_v31 = vld [vmem:[#allocation2 + $0x10a] sm:$0xff] }
 0x10a   : > { %v1061_v53 = vpop.f32.mrf.mxu2  ;;  %v821_v49 = vpop.f32.mrf.mxu1 }
 0x10b   : > { %v1149_v41 = vadd.f32 %v1061_v53, %v819_v23  ;;  %v1612_v17 = vpop.f32.mrf.mxu0  ;;  %v822_v3 = vadd.f32 %v821_v49, %v4043_v9 }
 0x10c   : > { %v1337_v34 = vpop.f32.mrf.mxu3 }
 0x10d   : > { %v1425_v13 = vadd.f32 %v1337_v34, %v1149_v41  ;;  %3114 = vmatmul.msk.f32.gmra.mxu1 %vm354_vm0, %v4134_v11  ;;  %3212 = vmatmul.msk.f32.gmra.mxu0 %vm354_vm0, %v3815_v20 }
 0x10f   : > { %v4166_v33 = vadd.f32 %v1612_v17, %v1425_v13  ;;  %3147 = vmatmul.msk.f32.gmra.mxu2 %vm354_vm0, %v4158_v8  ;;  %v4179_v17 = vld [vmem:[#allocation2 + $0x120] sm:$0xff] }
 0x111   : > { %4822 = vst [vmem:[#allocation38_spill] sm:$0xff] %v4166_v33  ;;  %3180 = vmatmul.msk.f32.gmra.mxu3 %vm354_vm0, %v4164_v5  ;;  %v4188_v33 = vld [vmem:[#allocation2 + $0x112] sm:$0xff] }
 0x112   : > { %v1064_v1 = vpop.f32.mrf.mxu2  ;;  %v824_v23 = vpop.f32.mrf.mxu1 }
 0x113   : > { %v1150_v53 = vadd.f32 %v1064_v1, %v822_v3  ;;  %v1615_v41 = vpop.f32.mrf.mxu0  ;;  %v825_v49 = vadd.f32 %v824_v23, %v4063_v37 }
 0x114   : > { %v1340_v34 = vpop.f32.mrf.mxu3 }
 0x115   : > { %v1426_v20 = vadd.f32 %v1340_v34, %v1150_v53  ;;  %3115 = vmatmul.msk.f32.gmra.mxu1 %vm354_vm0, %v4149_v61  ;;  %3213 = vmatmul.msk.f32.gmra.mxu0 %vm354_vm0, %v3831_v26 }
 0x117   : > { %v4181_v9 = vadd.f32 %v1615_v41, %v1426_v20  ;;  %3148 = vmatmul.msk.f32.gmra.mxu2 %vm354_vm0, %v4173_v31  ;;  %v4194_v41 = vld [vmem:[#allocation2 + $0x128] sm:$0xff] }
 0x119   : > { %4823 = vst [vmem:[#allocation39_spill] sm:$0xff] %v4181_v9  ;;  %3181 = vmatmul.msk.f32.gmra.mxu3 %vm354_vm0, %v4179_v17  ;;  %v4203_v9 = vld [vmem:[#allocation2 + $0x122] sm:$0xff] }
 0x11a   : > { %v1067_v13 = vpop.f32.mrf.mxu2  ;;  %v827_v3 = vpop.f32.mrf.mxu1 }
 0x11b   : > { %v1151_v1 = vadd.f32 %v1067_v13, %v825_v49  ;;  %v1618_v53 = vpop.f32.mrf.mxu0  ;;  %v828_v23 = vadd.f32 %v827_v3, %v4081_v25 }
 0x11c   : > { %v1343_v34 = vpop.f32.mrf.mxu3 }
 0x11d   : > { %v1427_v26 = vadd.f32 %v1343_v34, %v1151_v1  ;;  %3116 = vmatmul.msk.f32.gmra.mxu1 %vm354_vm0, %v4164_v5  ;;  %3214 = vmatmul.msk.f32.gmra.mxu0 %vm354_vm0, %v3652_v22 }
 0x11f   : > { %v4196_v37 = vadd.f32 %v1618_v53, %v1427_v26  ;;  %3149 = vmatmul.msk.f32.gmra.mxu2 %vm354_vm0, %v4188_v33  ;;  %v4209_v53 = vld [vmem:[#allocation2 + $0x138] sm:$0xff] }
 0x121   : > { %4824 = vst [vmem:[#allocation40_spill] sm:$0xff] %v4196_v37  ;;  %3182 = vmatmul.msk.f32.gmra.mxu3 %vm354_vm0, %v4194_v41 }
 0x122   : > { %v1070_v20 = vpop.f32.mrf.mxu2  ;;  %v830_v49 = vpop.f32.mrf.mxu1 }
 0x123   : > { %v1152_v13 = vadd.f32 %v1070_v20, %v828_v23  ;;  %v1621_v1 = vpop.f32.mrf.mxu0  ;;  %v831_v3 = vadd.f32 %v830_v49, %v3925_v54  ;;  %v4231_v54 = vld [vmem:[#allocation2 + $0x140] sm:$0xff] }
 0x124   : > { %v1346_v34 = vpop.f32.mrf.mxu3 }
 0x125   : > { %v1428_v22 = vadd.f32 %v1346_v34, %v1152_v13  ;;  %3117 = vmatmul.msk.f32.gmra.mxu1 %vm354_vm0, %v4179_v17  ;;  %3215 = vmatmul.msk.f32.gmra.mxu0 %vm354_vm0, %v3675_v32  ;;  %v4220_v32 = vld [vmem:[#allocation2 + $0x12a] sm:$0xff] }
 0x127   : > { %v4211_v25 = vadd.f32 %v1621_v1, %v1428_v22  ;;  %3150 = vmatmul.msk.f32.gmra.mxu2 %vm354_vm0, %v4203_v9  ;;  %v404_v1 = vld [vmem:[%s4229_s21] sm:$0xff] }
 0x128   : > { %411 = vst.msk [vmem:[#allocation2 + $0x180] sm:$0xff] %vm354_vm0, %v404_v1 }
 0x129   : > { %4825 = vst [vmem:[#allocation41_spill] sm:$0xff] %v4211_v25  ;;  %3183 = vmatmul.msk.f32.gmra.mxu3 %vm354_vm0, %v4209_v53  ;;  %v4242_v25 = vld [vmem:[#allocation2 + $0x13a] sm:$0xff] }
 0x12a   : > { %v1073_v26 = vpop.f32.mrf.mxu2  ;;  %v833_v23 = vpop.f32.mrf.mxu1 }
 0x12b   : > { %v1153_v20 = vadd.f32 %v1073_v26, %v831_v3  ;;  %v1624_v13 = vpop.f32.mrf.mxu0  ;;  %v834_v22 = vadd.f32 %v833_v23, %v3941_v58  ;;  %v4248_v58 = vld [vmem:[#allocation2 + $0x150] sm:$0xff] }
 0x12c   : > { %v1349_v34 = vpop.f32.mrf.mxu3 }
 0x12d   : > { %v1429_v37 = vadd.f32 %v1349_v34, %v1153_v20  ;;  %3118 = vmatmul.msk.f32.gmra.mxu1 %vm354_vm0, %v4194_v41  ;;  %3216 = vmatmul.msk.f32.gmra.mxu0 %vm354_vm0, %v3704_v44 }
 0x12f   : > { %v4233_v49 = vadd.f32 %v1624_v13, %v1429_v37  ;;  %3151 = vmatmul.msk.f32.gmra.mxu2 %vm354_vm0, %v4220_v32  ;;  %v405_v13 = vld [vmem:[%s4229_s21 + $0x8] sm:$0xff] }
 0x130   : > { %412 = vst.msk [vmem:[#allocation2 + $0x188] sm:$0xff] %vm354_vm0, %v405_v13 }
 0x131   : > { %4826 = vst [vmem:[#allocation42_spill] sm:$0xff] %v4233_v49  ;;  %3184 = vmatmul.msk.f32.gmra.mxu3 %vm354_vm0, %v4231_v54  ;;  %v4259_v49 = vld [vmem:[#allocation2 + $0x142] sm:$0xff] }
 0x132   : > { %v1076_v44 = vpop.f32.mrf.mxu2  ;;  %v836_v3 = vpop.f32.mrf.mxu1 }
 0x133   : > { %v1154_v26 = vadd.f32 %v1076_v44, %v834_v22  ;;  %v1627_v20 = vpop.f32.mrf.mxu0  ;;  %v837_v1 = vadd.f32 %v836_v3, %v3961_v0  ;;  %v4265_v0 = vld [vmem:[#allocation2 + $0x158] sm:$0xff] }
 0x134   : > { %v1352_v34 = vpop.f32.mrf.mxu3  ;;  %4828 = vst [vmem:[#allocation44_spill] sm:$0xff] %v4265_v0 }
 0x135   : > { %v1430_v37 = vadd.f32 %v1352_v34, %v1154_v26  ;;  %3119 = vmatmul.msk.f32.gmra.mxu1 %vm354_vm0, %v4209_v53  ;;  %3217 = vmatmul.msk.f32.gmra.mxu0 %vm354_vm0, %v3736_v56 }
 0x137   : > { %v4250_v23 = vadd.f32 %v1627_v20, %v1430_v37  ;;  %3152 = vmatmul.msk.f32.gmra.mxu2 %vm354_vm0, %v4242_v25  ;;  %v406_v37 = vld [vmem:[%s4229_s21 + $0x10] sm:$0x3] }
 0x138   : > { %413 = vst.msk [vmem:[#allocation2 + $0x190] sm:$0x3] %vm357_vm1, %v406_v37 }
 0x139   : > { %4827 = vst [vmem:[#allocation43_spill] sm:$0xff] %v4250_v23  ;;  %3185 = vmatmul.msk.f32.gmra.mxu3 %vm354_vm0, %v4248_v58  ;;  %v4276_v23 = vld [vmem:[#allocation2 + $0x152] sm:$0xff] }
 0x13a   : > { %v1079_v22 = vpop.f32.mrf.mxu2  ;;  %v839_v44 = vpop.f32.mrf.mxu1 }
 0x13b   : > { %v1155_v26 = vadd.f32 %v1079_v22, %v837_v1  ;;  %v1630_v56 = vpop.f32.mrf.mxu0  ;;  %v840_v13 = vadd.f32 %v839_v44, %v3981_v7  ;;  %v4282_v7 = vld [vmem:[#allocation2 + $0x168] sm:$0xff] }
 0x13c   : > { %v1355_v34 = vpop.f32.mrf.mxu3 }
 0x13d   : > { %v1431_v20 = vadd.f32 %v1355_v34, %v1155_v26  ;;  %3120 = vmatmul.msk.f32.gmra.mxu1 %vm354_vm0, %v4231_v54  ;;  %3218 = vmatmul.msk.f32.gmra.mxu0 %vm354_vm0, %v3768_v4 }
 0x13f   : > { %v4267_v3 = vadd.f32 %v1630_v56, %v1431_v20  ;;  %3153 = vmatmul.msk.f32.gmra.mxu2 %vm354_vm0, %v4259_v49 }
 0x141   : > { %4829 = vst [vmem:[#allocation45_spill] sm:$0xff] %v4267_v3  ;;  %3186 = vmatmul.msk.f32.gmra.mxu3 %vm354_vm0, %v4265_v0  ;;  %v4291_v3 = vld [vmem:[#allocation2 + $0x15a] sm:$0xff] }
 0x142   : > { %v1082_v1 = vpop.f32.mrf.mxu2  ;;  %v842_v22 = vpop.f32.mrf.mxu1 }
 0x143   : > { %v1156_v26 = vadd.f32 %v1082_v1, %v840_v13  ;;  %v1633_v34 = vpop.f32.mrf.mxu0  ;;  %v843_v20 = vadd.f32 %v842_v22, %v4001_v29 }
 0x144   : > { %v1358_v4 = vpop.f32.mrf.mxu3 }
 0x145   : > { %v1432_v56 = vadd.f32 %v1358_v4, %v1156_v26  ;;  %3121 = vmatmul.msk.f32.gmra.mxu1 %vm354_vm0, %v4248_v58  ;;  %3219 = vmatmul.msk.f32.gmra.mxu0 %vm354_vm0, %v3802_v14 }
 0x147   : > { %v4284_v44 = vadd.f32 %v1633_v34, %v1432_v56  ;;  %3154 = vmatmul.msk.f32.gmra.mxu2 %vm354_vm0, %v4276_v23  ;;  %v1207_v34 = vld [vmem:[#allocation2 + $0x170] sm:$0xff] }
 0x149   : > { %4830 = vst [vmem:[#allocation46_spill] sm:$0xff] %v4284_v44  ;;  %3187 = vmatmul.msk.f32.gmra.mxu3 %vm354_vm0, %v4282_v7  ;;  %v4303_v44 = vld [vmem:[#allocation2 + $0x16a] sm:$0xff] }
 0x14a   : > { %v1085_v37 = vpop.f32.mrf.mxu2  ;;  %v845_v13 = vpop.f32.mrf.mxu1 }
 0x14b   : > { %v1157_v1 = vadd.f32 %v1085_v37, %v843_v20  ;;  %v1636_v26 = vpop.f32.mrf.mxu0  ;;  %v846_v29 = vadd.f32 %v845_v13, %v4021_v36 }
 0x14c   : > { %v1361_v4 = vpop.f32.mrf.mxu3 }
 0x14d   : > { %v1433_v14 = vadd.f32 %v1361_v4, %v1157_v1  ;;  %3122 = vmatmul.msk.f32.gmra.mxu1 %vm354_vm0, %v4265_v0  ;;  %3220 = vmatmul.msk.f32.gmra.mxu0 %vm354_vm0, %v3821_v21  ;;  %v4309_v21 = vld [vmem:[#allocation2 + $0x180] sm:$0xff] }
 0x14f   : > { %v4297_v56 = vadd.f32 %v1636_v26, %v1433_v14  ;;  %3155 = vmatmul.msk.f32.gmra.mxu2 %vm354_vm0, %v4291_v3 }
 0x151   : > { %4831 = vst [vmem:[#allocation47_spill] sm:$0xff] %v4297_v56  ;;  %3188 = vmatmul.msk.f32.gmra.mxu3 %vm354_vm0, %v1207_v34 }
 0x152   : > { %v1088_v22 = vpop.f32.mrf.mxu2  ;;  %v848_v20 = vpop.f32.mrf.mxu1 }
 0x153   : > { %v1158_v37 = vadd.f32 %v1088_v22, %v846_v29  ;;  %v1639_v1 = vpop.f32.mrf.mxu0  ;;  %v849_v36 = vadd.f32 %v848_v20, %v4041_v60  ;;  %v4318_v29 = vld [vmem:[#allocation2 + $0x181] sm:$0xff] }
 0x154   : > { %v1364_v4 = vpop.f32.mrf.mxu3 }
 0x155   : > { %v1434_v0 = vadd.f32 %v1364_v4, %v1158_v37  ;;  %3123 = vmatmul.msk.f32.gmra.mxu1 %vm354_vm0, %v4282_v7  ;;  %3221 = vmatmul.msk.f32.gmra.mxu0 %vm354_vm0, %v3837_v27  ;;  %v4320_v27 = vld [vmem:[#allocation2 + $0x172] sm:$0xff] }
 0x157   : > { %v4311_v26 = vadd.f32 %v1639_v1, %v1434_v0  ;;  %3156 = vmatmul.msk.f32.gmra.mxu2 %vm354_vm0, %v4303_v44  ;;  %v4325_v0 = vld [vmem:[#allocation2 + $0x188] sm:$0xff] }
 0x159   : > { %4832 = vst [vmem:[#allocation48_spill] sm:$0xff] %v4311_v26  ;;  %3189 = vmatmul.msk.f32.gmra.mxu3 %vm354_vm0, %v4309_v21 }
 0x15a   : > { %v1091_v13 = vpop.f32.mrf.mxu2  ;;  %v851_v14 = vpop.f32.mrf.mxu1 }
 0x15b   : > { %v1159_v22 = vadd.f32 %v1091_v13, %v849_v36  ;;  %v1642_v37 = vpop.f32.mrf.mxu0  ;;  %v852_v20 = vadd.f32 %v851_v14, %v4061_v10  ;;  %v4334_v13 = vld [vmem:[#allocation2 + $0x189] sm:$0xff] }
 0x15c   : > { %v1367_v4 = vpop.f32.mrf.mxu3 }
 0x15d   : > { %v1435_v56 = vadd.f32 %v1367_v4, %v1159_v22  ;;  %3124 = vmatmul.msk.f32.gmra.mxu1 %vm354_vm0, %v1207_v34  ;;  %3222 = vmatmul.msk.f32.gmra.mxu0 %vm354_vm0, %v4318_v29 }
 0x15f   : > { %v4327_v60 = vadd.f32 %v1642_v37, %v1435_v56  ;;  %3157 = vmatmul.msk.f32.gmra.mxu2 %vm354_vm0, %v4320_v27 }
 0x161   : > { %3190 = vmatmul.msk.f32.gmra.mxu3 %vm354_vm0, %v4325_v0 }
 0x162   : > { %v1094_v1 = vpop.f32.mrf.mxu2  ;;  %v854_v36 = vpop.f32.mrf.mxu1 }
 0x163   : > { %v1160_v34 = vadd.f32 %v1094_v1, %v852_v20  ;;  %v1645_v22 = vpop.f32.mrf.mxu0  ;;  %v855_v10 = vadd.f32 %v854_v36, %v3939_v16 }
 0x164   : > { %v1370_v4 = vpop.f32.mrf.mxu3 }
 0x165   : > { %v1436_v26 = vadd.f32 %v1370_v4, %v1160_v34  ;;  %3225 = vmatmul.msk.f32.vlgmr.msra.gmra.mxu1 %vm354_vm0, %v3855_v38  ;;  %3223 = vmatmul.msk.f32.gmra.mxu0 %vm354_vm0, %v4334_v13 }
 0x167   : > { %v4340_v56 = vadd.f32 %v1645_v22, %v1436_v26  ;;  %3258 = vmatmul.msk.f32.vlgmr.msra.gmra.mxu2 %vm354_vm0, %v3860_v39 }
 0x169   : > { %3291 = vmatmul.msk.f32.vlgmr.msra.gmra.mxu3 %vm354_vm0, %v3792_v12 }
 0x16a   : > { %v1097_v14 = vpop.f32.mrf.mxu2  ;;  %v857_v37 = vpop.f32.mrf.mxu1 }
 0x16b   : > { %v1161_v20 = vadd.f32 %v1097_v14, %v855_v10  ;;  %v1648_v1 = vpop.f32.mrf.mxu0  ;;  %v858_v39 = vadd.f32 %v857_v37, %v3959_v63 }
 0x16c   : > { %v1373_v34 = vpop.f32.mrf.mxu3 }
 0x16d   : > { %v1437_v4 = vadd.f32 %v1373_v34, %v1161_v20  ;;  %3226 = vmatmul.msk.f32.gmra.mxu1 %vm354_vm0, %v3866_v40  ;;  %3324 = vmatmul.msk.f32.vlgmr.msra.gmra.mxu0 %vm354_vm0, %v3877_v43 }
 0x16f   : > { %v4351_v38 = vadd.f32 %v1648_v1, %v1437_v4  ;;  %3259 = vmatmul.msk.f32.gmra.mxu2 %vm354_vm0, %v3871_v42 }
 0x171   : > { %3292 = vmatmul.msk.f32.gmra.mxu3 %vm354_vm0, %v3813_v18 }
 0x172   : > { %v1100_v12 = vpop.f32.mrf.mxu2  ;;  %v860_v16 = vpop.f32.mrf.mxu1 }
 0x173   : > { %v1162_v26 = vadd.f32 %v1100_v12, %v858_v39  ;;  %v1651_v36 = vpop.f32.mrf.mxu0  ;;  %v861_v42 = vadd.f32 %v860_v16, %v3979_v6 }
 0x174   : > { %v1376_v22 = vpop.f32.mrf.mxu3 }
 0x175   : > { %v1438_v10 = vadd.f32 %v1376_v22, %v1162_v26  ;;  %3227 = vmatmul.msk.f32.gmra.mxu1 %vm354_vm0, %v3877_v43  ;;  %3325 = vmatmul.msk.f32.gmra.mxu0 %vm354_vm0, %v3889_v46 }
 0x177   : > { %v4362_v40 = vadd.f32 %v1651_v36, %v1438_v10  ;;  %3260 = vmatmul.msk.f32.gmra.mxu2 %vm354_vm0, %v3883_v45 }
 0x179   : > { %3293 = vmatmul.msk.f32.gmra.mxu3 %vm354_vm0, %v3829_v24 }
 0x17a   : > { %v1103_v18 = vpop.f32.mrf.mxu2  ;;  %v863_v63 = vpop.f32.mrf.mxu1 }
 0x17b   : > { %v1163_v14 = vadd.f32 %v1103_v18, %v861_v42  ;;  %v1654_v37 = vpop.f32.mrf.mxu0  ;;  %v864_v45 = vadd.f32 %v863_v63, %v3999_v15 }
 0x17c   : > { %v1379_v20 = vpop.f32.mrf.mxu3 }
 0x17d   : > { %v1439_v1 = vadd.f32 %v1379_v20, %v1163_v14  ;;  %3228 = vmatmul.msk.f32.gmra.mxu1 %vm354_vm0, %v3889_v46  ;;  %3326 = vmatmul.msk.f32.gmra.mxu0 %vm354_vm0, %v3901_v48  ;;  %v2283_v46 = vld [vmem:[#allocation2 + $0x61] sm:$0xff] }
 0x17f   : > { %v4373_v43 = vadd.f32 %v1654_v37, %v1439_v1  ;;  %3261 = vmatmul.msk.f32.gmra.mxu2 %vm354_vm0, %v3895_v47 }
 0x181   : > { %3294 = vmatmul.msk.f32.gmra.mxu3 %vm354_vm0, %v3843_v30 }
 0x182   : > { %v1106_v24 = vpop.f32.mrf.mxu2  ;;  %v866_v6 = vpop.f32.mrf.mxu1 }
 0x183   : > { %v1164_v34 = vadd.f32 %v1106_v24, %v864_v45  ;;  %v1657_v4 = vpop.f32.mrf.mxu0  ;;  %v867_v30 = vadd.f32 %v866_v6, %v4019_v35  ;;  %v4834_v35 = vld [vmem:[#allocation23_spill] sm:$0xff] }
 0x184   : > { %v1382_v39 = vpop.f32.mrf.mxu3  ;;  %v2285_v24 = vld [vmem:[#allocation2 + $0x79] sm:$0xff] }
 0x185   : > { %v1440_v12 = vadd.f32 %v1382_v39, %v1164_v34  ;;  %3229 = vmatmul.msk.f32.gmra.mxu1 %vm354_vm0, %v3901_v48  ;;  %3327 = vmatmul.msk.f32.gmra.mxu0 %vm354_vm0, %v3913_v51  ;;  %v2284_v48 = vld [vmem:[#allocation2 + $0x69] sm:$0xff]  ;;  %v4836_v34 = vld [vmem:[#allocation7_spill] sm:$0xff] }
 0x187   : > { %v4384_v16 = vadd.f32 %v1657_v4, %v1440_v12  ;;  %3262 = vmatmul.msk.f32.gmra.mxu2 %vm354_vm0, %v3907_v50  ;;  %v4833_v50 = vld [vmem:[#allocation6_spill] sm:$0xff]  ;;  %v4837_v4 = vld [vmem:[#allocation27_spill] sm:$0xff] }
 0x189   : > { %3295 = vmatmul.msk.f32.gmra.mxu3 %vm354_vm0, %v2283_v46 }
 0x18a   : > { %v1109_v47 = vpop.f32.mrf.mxu2  ;;  %v869_v15 = vpop.f32.mrf.mxu1 }
 0x18b   : > { %v1165_v26 = vadd.f32 %v1109_v47, %v867_v30  ;;  %v1660_v36 = vpop.f32.mrf.mxu0  ;;  %v870_v18 = vadd.f32 %v869_v15, %v4834_v35 }
 0x18c   : > { %v1385_v22 = vpop.f32.mrf.mxu3 }
 0x18d   : > { %v1441_v10 = vadd.f32 %v1385_v22, %v1165_v26  ;;  %3230 = vmatmul.msk.f32.gmra.mxu1 %vm354_vm0, %v3913_v51  ;;  %3328 = vmatmul.msk.f32.gmra.mxu0 %vm354_vm0, %v3927_v55  ;;  %v4835_v51 = vld [vmem:[#allocation9_spill] sm:$0xff] }
 0x18f   : > { %v4394_v42 = vadd.f32 %v1660_v36, %v1441_v10  ;;  %3263 = vmatmul.msk.f32.gmra.mxu2 %vm354_vm0, %v4833_v50  ;;  %v2286_v36 = vld [vmem:[#allocation2 + $0x81] sm:$0xff]  ;;  %v4839_v10 = vld [vmem:[#allocation10_spill] sm:$0xff] }
 0x191   : > { %3296 = vmatmul.msk.f32.gmra.mxu3 %vm354_vm0, %v2284_v48  ;;  %v4840_v48 = vld [vmem:[#allocation31_spill] sm:$0xff] }
 0x192   : > { %v1112_v63 = vpop.f32.mrf.mxu2  ;;  %v872_v14 = vpop.f32.mrf.mxu1 }
 0x193   : > { %v1166_v37 = vadd.f32 %v1112_v63, %v870_v18  ;;  %v1663_v20 = vpop.f32.mrf.mxu0  ;;  %v873_v39 = vadd.f32 %v872_v14, %v4837_v4 }
 0x194   : > { %v1388_v1 = vpop.f32.mrf.mxu3 }
 0x195   : > { %v1442_v45 = vadd.f32 %v1388_v1, %v1166_v37  ;;  %3231 = vmatmul.msk.f32.gmra.mxu1 %vm354_vm0, %v3927_v55  ;;  %3329 = vmatmul.msk.f32.gmra.mxu0 %vm354_vm0, %v4835_v51  ;;  %v4838_v55 = vld [vmem:[#allocation12_spill] sm:$0xff]  ;;  %v4841_v1 = vld [vmem:[#allocation15_spill] sm:$0xff] }
 0x197   : > { %v4404_v6 = vadd.f32 %v1663_v20, %v1442_v45  ;;  %3264 = vmatmul.msk.f32.gmra.mxu2 %vm354_vm0, %v4836_v34  ;;  %v2287_v45 = vld [vmem:[#allocation2 + $0x91] sm:$0xff]  ;;  %v4843_v34 = vld [vmem:[#allocation8_spill] sm:$0xff] }
 0x199   : > { %3297 = vmatmul.msk.f32.gmra.mxu3 %vm354_vm0, %v2285_v24  ;;  %v4842_v24 = vld [vmem:[#allocation13_spill] sm:$0xff] }
 0x19a   : > { %v1115_v12 = vpop.f32.mrf.mxu2  ;;  %v875_v46 = vpop.f32.mrf.mxu1 }
 0x19b   : > { %v1167_v30 = vadd.f32 %v1115_v12, %v873_v39  ;;  %v1666_v47 = vpop.f32.mrf.mxu0  ;;  %v876_v50 = vadd.f32 %v875_v46, %v4840_v48  ;;  %v4846_v48 = vld [vmem:[#allocation11_spill] sm:$0xff] }
 0x19c   : > { %v1391_v15 = vpop.f32.mrf.mxu3 }
 0x19d   : > { %v1443_v26 = vadd.f32 %v1391_v15, %v1167_v30  ;;  %3232 = vmatmul.msk.f32.gmra.mxu1 %vm354_vm0, %v4835_v51  ;;  %3330 = vmatmul.msk.f32.gmra.mxu0 %vm354_vm0, %v4838_v55 }
 0x19f   : > { %v4414_v22 = vadd.f32 %v1666_v47, %v1443_v26  ;;  %3265 = vmatmul.msk.f32.gmra.mxu2 %vm354_vm0, %v4839_v10  ;;  %v4844_v26 = vld [vmem:[#allocation18_spill] sm:$0xff]  ;;  %v4845_v10 = vld [vmem:[#allocation16_spill] sm:$0xff] }
 0x1a1   : > { %3298 = vmatmul.msk.f32.gmra.mxu3 %vm354_vm0, %v2286_v36 }
 0x1a2   : > { %v1118_v35 = vpop.f32.mrf.mxu2  ;;  %v878_v18 = vpop.f32.mrf.mxu1 }
 0x1a3   : > { %v1168_v63 = vadd.f32 %v1118_v35, %v876_v50  ;;  %v1669_v14 = vpop.f32.mrf.mxu0  ;;  %v879_v4 = vadd.f32 %v878_v18, %v4843_v34  ;;  %v4848_v34 = vld [vmem:[#allocation19_spill] sm:$0xff] }
 0x1a4   : > { %v1394_v37 = vpop.f32.mrf.mxu3 }
 0x1a5   : > { %v1444_v20 = vadd.f32 %v1394_v37, %v1168_v63  ;;  %3233 = vmatmul.msk.f32.gmra.mxu1 %vm354_vm0, %v4838_v55  ;;  %3331 = vmatmul.msk.f32.gmra.mxu0 %vm354_vm0, %v4841_v1  ;;  %v2288_v55 = vld [vmem:[#allocation2 + $0x99] sm:$0xff] }
 0x1a7   : > { %v4424_v51 = vadd.f32 %v1669_v14, %v1444_v20  ;;  %3266 = vmatmul.msk.f32.gmra.mxu2 %vm354_vm0, %v4842_v24 }
 0x1a9   : > { %3299 = vmatmul.msk.f32.gmra.mxu3 %vm354_vm0, %v2287_v45  ;;  %v2289_v45 = vld [vmem:[#allocation2 + $0xa9] sm:$0xff] }
 0x1aa   : > { %v1121_v39 = vpop.f32.mrf.mxu2  ;;  %v881_v12 = vpop.f32.mrf.mxu1 }
 0x1ab   : > { %v1169_v46 = vadd.f32 %v1121_v39, %v879_v4  ;;  %v1672_v30 = vpop.f32.mrf.mxu0  ;;  %v882_v50 = vadd.f32 %v881_v12, %v4846_v48  ;;  %v4849_v4 = vld [vmem:[#allocation14_spill] sm:$0xff] }
 0x1ac   : > { %v1397_v47 = vpop.f32.mrf.mxu3 }
 0x1ad   : > { %v1445_v15 = vadd.f32 %v1397_v47, %v1169_v46  ;;  %3234 = vmatmul.msk.f32.gmra.mxu1 %vm354_vm0, %v4841_v1  ;;  %3332 = vmatmul.msk.f32.gmra.mxu0 %vm354_vm0, %v4844_v26  ;;  %v4847_v1 = vld [vmem:[#allocation21_spill] sm:$0xff] }
 0x1af   : > { %v4434_v36 = vadd.f32 %v1672_v30, %v1445_v15  ;;  %3267 = vmatmul.msk.f32.gmra.mxu2 %vm354_vm0, %v4845_v10  ;;  %v2290_v10 = vld [vmem:[#allocation2 + $0xb1] sm:$0xff] }
 0x1b1   : > { %3300 = vmatmul.msk.f32.gmra.mxu3 %vm354_vm0, %v2288_v55 }
 0x1b2   : > { %v1124_v35 = vpop.f32.mrf.mxu2  ;;  %v884_v18 = vpop.f32.mrf.mxu1 }
 0x1b3   : > { %v1170_v63 = vadd.f32 %v1124_v35, %v882_v50  ;;  %v1675_v14 = vpop.f32.mrf.mxu0  ;;  %v885_v39 = vadd.f32 %v884_v18, %v4849_v4  ;;  %v4851_v50 = vld [vmem:[#allocation22_spill] sm:$0xff]  ;;  %v4852_v35 = vld [vmem:[#allocation17_spill] sm:$0xff] }
 0x1b4   : > { %v1400_v37 = vpop.f32.mrf.mxu3  ;;  %v2291_v4 = vld [vmem:[#allocation2 + $0xc1] sm:$0xff] }
 0x1b5   : > { %v1446_v20 = vadd.f32 %v1400_v37, %v1170_v63  ;;  %3235 = vmatmul.msk.f32.gmra.mxu1 %vm354_vm0, %v4844_v26  ;;  %3333 = vmatmul.msk.f32.gmra.mxu0 %vm354_vm0, %v4847_v1  ;;  %v4850_v26 = vld [vmem:[#allocation25_spill] sm:$0xff] }
 0x1b7   : > { %v4444_v24 = vadd.f32 %v1675_v14, %v1446_v20  ;;  %3268 = vmatmul.msk.f32.gmra.mxu2 %vm354_vm0, %v4848_v34 }
 0x1b9   : > { %3301 = vmatmul.msk.f32.gmra.mxu3 %vm354_vm0, %v2289_v45 }
 0x1ba   : > { %v1127_v12 = vpop.f32.mrf.mxu2  ;;  %v887_v46 = vpop.f32.mrf.mxu1 }
 0x1bb   : > { %v1171_v30 = vadd.f32 %v1127_v12, %v885_v39  ;;  %v1678_v47 = vpop.f32.mrf.mxu0  ;;  %v888_v18 = vadd.f32 %v887_v46, %v4852_v35  ;;  %v4854_v12 = vld [vmem:[#allocation26_spill] sm:$0xff]  ;;  %v4855_v46 = vld [vmem:[#allocation20_spill] sm:$0xff] }
 0x1bc   : > { %v1403_v15 = vpop.f32.mrf.mxu3 }
 0x1bd   : > { %v1447_v55 = vadd.f32 %v1403_v15, %v1171_v30  ;;  %3236 = vmatmul.msk.f32.gmra.mxu1 %vm354_vm0, %v4847_v1  ;;  %3334 = vmatmul.msk.f32.gmra.mxu0 %vm354_vm0, %v4850_v26  ;;  %v4853_v1 = vld [vmem:[#allocation29_spill] sm:$0xff] }
 0x1bf   : > { %v4454_v48 = vadd.f32 %v1678_v47, %v1447_v55  ;;  %3269 = vmatmul.msk.f32.gmra.mxu2 %vm354_vm0, %v4851_v50 }
 0x1c1   : > { %3302 = vmatmul.msk.f32.gmra.mxu3 %vm354_vm0, %v2290_v10 }
 0x1c2   : > { %v1130_v63 = vpop.f32.mrf.mxu2  ;;  %v890_v14 = vpop.f32.mrf.mxu1 }
 0x1c3   : > { %v1172_v37 = vadd.f32 %v1130_v63, %v888_v18  ;;  %v1681_v20 = vpop.f32.mrf.mxu0  ;;  %v891_v30 = vadd.f32 %v890_v14, %v4855_v46  ;;  %v2292_v18 = vld [vmem:[#allocation2 + $0xc9] sm:$0xff]  ;;  %v4858_v14 = vld [vmem:[#allocation24_spill] sm:$0xff] }
 0x1c4   : > { %v1406_v45 = vpop.f32.mrf.mxu3 }
 0x1c5   : > { %v1448_v34 = vadd.f32 %v1406_v45, %v1172_v37  ;;  %3237 = vmatmul.msk.f32.gmra.mxu1 %vm354_vm0, %v4850_v26  ;;  %3335 = vmatmul.msk.f32.gmra.mxu0 %vm354_vm0, %v4853_v1  ;;  %v4856_v26 = vld [vmem:[#allocation33_spill] sm:$0xff]  ;;  %v4857_v37 = vld [vmem:[#allocation30_spill] sm:$0xff] }
 0x1c7   : > { %v4464_v39 = vadd.f32 %v1681_v20, %v1448_v34  ;;  %3270 = vmatmul.msk.f32.gmra.mxu2 %vm354_vm0, %v4854_v12 }
 0x1c9   : > { %3303 = vmatmul.msk.f32.gmra.mxu3 %vm354_vm0, %v2291_v4 }
 0x1ca   : > { %v1133_v47 = vpop.f32.mrf.mxu2  ;;  %v893_v15 = vpop.f32.mrf.mxu1 }
 0x1cb   : > { %v1173_v55 = vadd.f32 %v1133_v47, %v891_v30  ;;  %v1684_v10 = vpop.f32.mrf.mxu0  ;;  %v894_v20 = vadd.f32 %v893_v15, %v4858_v14  ;;  %v4859_v15 = vld [vmem:[#allocation28_spill] sm:$0xff] }
 0x1cc   : > { %v1409_v50 = vpop.f32.mrf.mxu3 }
 0x1cd   : > { %v1449_v35 = vadd.f32 %v1409_v50, %v1173_v55  ;;  %3238 = vmatmul.msk.f32.gmra.mxu1 %vm354_vm0, %v4853_v1  ;;  %3336 = vmatmul.msk.f32.gmra.mxu0 %vm354_vm0, %v4856_v26  ;;  %v2293_v1 = vld [vmem:[#allocation2 + $0xd9] sm:$0xff] }
 0x1cf   : > { %v4474_v63 = vadd.f32 %v1684_v10, %v1449_v35  ;;  %3271 = vmatmul.msk.f32.gmra.mxu2 %vm354_vm0, %v4857_v37 }
 0x1d1   : > { %3304 = vmatmul.msk.f32.gmra.mxu3 %vm354_vm0, %v2292_v18 }
 0x1d2   : > { %v1136_v45 = vpop.f32.mrf.mxu2  ;;  %v896_v34 = vpop.f32.mrf.mxu1 }
 0x1d3   : > { %v1174_v4 = vadd.f32 %v1136_v45, %v894_v20  ;;  %v1687_v12 = vpop.f32.mrf.mxu0  ;;  %v897_v55 = vadd.f32 %v896_v34, %v4859_v15  ;;  %v4861_v15 = vld [vmem:[#allocation34_spill] sm:$0xff] }
 0x1d4   : > { %v1412_v46 = vpop.f32.mrf.mxu3 }
 0x1d5   : > { %v1450_v30 = vadd.f32 %v1412_v46, %v1174_v4  ;;  %3239 = vmatmul.msk.f32.gmra.mxu1 %vm354_vm0, %v4856_v26  ;;  %3337 = vmatmul.msk.f32.gmra.mxu0 %vm354_vm0, %v4098_v52  ;;  %v2294_v26 = vld [vmem:[#allocation2 + $0xe1] sm:$0xff] }
 0x1d7   : > { %v4484_v47 = vadd.f32 %v1687_v12, %v1450_v30  ;;  %3272 = vmatmul.msk.f32.gmra.mxu2 %vm354_vm0, %v4091_v19  ;;  %v4860_v19 = vld [vmem:[#allocation32_spill] sm:$0xff] }
 0x1d9   : > { %3305 = vmatmul.msk.f32.gmra.mxu3 %vm354_vm0, %v2293_v1  ;;  %v2295_v1 = vld [vmem:[#allocation2 + $0xf1] sm:$0xff] }
 0x1da   : > { %v1139_v10 = vpop.f32.mrf.mxu2  ;;  %v899_v50 = vpop.f32.mrf.mxu1 }
 0x1db   : > { %v1175_v35 = vadd.f32 %v1139_v10, %v897_v55  ;;  %v1690_v18 = vpop.f32.mrf.mxu0  ;;  %v900_v45 = vadd.f32 %v899_v50, %v4860_v19  ;;  %v4862_v19 = vld [vmem:[#allocation35_spill] sm:$0xff] }
 0x1dc   : > { %v1415_v37 = vpop.f32.mrf.mxu3 }
 0x1dd   : > { %v1451_v14 = vadd.f32 %v1415_v37, %v1175_v35  ;;  %3240 = vmatmul.msk.f32.gmra.mxu1 %vm354_vm0, %v4098_v52  ;;  %3338 = vmatmul.msk.f32.gmra.mxu0 %vm354_vm0, %v4113_v57 }
 0x1df   : > { %v4494_v20 = vadd.f32 %v1690_v18, %v1451_v14  ;;  %3273 = vmatmul.msk.f32.gmra.mxu2 %vm354_vm0, %v4104_v28  ;;  %v4516_v14 = vld [vmem:[%s4760_s3] ss:$0 sm:$0xff] }
 0x1e1   : > { %3306 = vmatmul.msk.f32.gmra.mxu3 %vm354_vm0, %v2294_v26 }
 0x1e2   : > { %v1142_v34 = vpop.f32.mrf.mxu2  ;;  %v1875_v4 = vpop.f32.mrf.mxu1 }
 0x1e3   : > { %v1176_v12 = vadd.f32 %v1142_v34, %v900_v45  ;;  %v1693_v46 = vpop.f32.mrf.mxu0  ;;  %v1971_v55 = vadd.f32 %v1875_v4, %v4861_v15  ;;  %v4863_v15 = vld [vmem:[#allocation36_spill] sm:$0xff] }
 0x1e4   : > { %v1418_v30 = vpop.f32.mrf.mxu3 }
 0x1e5   : > { %v1452_v52 = vadd.f32 %v1418_v30, %v1176_v12  ;;  %3241 = vmatmul.msk.f32.gmra.mxu1 %vm354_vm0, %v4113_v57  ;;  %3339 = vmatmul.msk.f32.gmra.mxu0 %vm354_vm0, %v4128_v59 }
 0x1e7   : > { %v4504_v28 = vadd.f32 %v1693_v46, %v1452_v52  ;;  %3274 = vmatmul.msk.f32.gmra.mxu2 %vm354_vm0, %v4119_v62  ;;  %v2296_v62 = vld [vmem:[#allocation2 + $0xf9] sm:$0xff] }
 0x1e9   : > { %3307 = vmatmul.msk.f32.gmra.mxu3 %vm354_vm0, %v2295_v1 }
 0x1ea   : > { %v2151_v10 = vpop.f32.mrf.mxu2  ;;  %v1878_v50 = vpop.f32.mrf.mxu1 }
 0x1eb   : > { %v2247_v35 = vadd.f32 %v2151_v10, %v1971_v55  ;;  %v2701_v18 = vpop.f32.mrf.mxu0  ;;  %v1972_v45 = vadd.f32 %v1878_v50, %v4862_v19 }
 0x1ec   : > { %v2426_v37 = vpop.f32.mrf.mxu3 }
 0x1ed   : > { %v2522_v57 = vadd.f32 %v2426_v37, %v2247_v35  ;;  %3242 = vmatmul.msk.f32.gmra.mxu1 %vm354_vm0, %v4128_v59  ;;  %3340 = vmatmul.msk.f32.gmra.mxu0 %vm354_vm0, %v4143_v2 }
 0x1ef   : > { %v2797_v26 = vadd.f32 %v2701_v18, %v2522_v57  ;;  %3275 = vmatmul.msk.f32.gmra.mxu2 %vm354_vm0, %v4134_v11  ;;  %v2297_v11 = vld [vmem:[#allocation2 + $0x109] sm:$0xff] }
 0x1f1   : > { %v2833_v34 = vadd.f32 %v4516_v14, %v2797_v26  ;;  %3308 = vmatmul.msk.f32.gmra.mxu3 %vm354_vm0, %v2296_v62  ;;  %v4864_v26 = vld [vmem:[#allocation37_spill] sm:$0xff] }
 0x1f2   : > { %v2154_v4 = vpop.f32.mrf.mxu2  ;;  %v1881_v12 = vpop.f32.mrf.mxu1 }
 0x1f3   : > { %2865 = vst [vmem:[%s4527_s26] sm:$0xff] %v2833_v34  ;;  %v2248_v59 = vadd.f32 %v2154_v4, %v1972_v45  ;;  %v2704_v46 = vpop.f32.mrf.mxu0  ;;  %v1973_v55 = vadd.f32 %v1881_v12, %v4863_v15 }
 0x1f4   : > { %v2429_v30 = vpop.f32.mrf.mxu3 }
 0x1f5   : > { %v2523_v52 = vadd.f32 %v2429_v30, %v2248_v59  ;;  %3243 = vmatmul.msk.f32.gmra.mxu1 %vm354_vm0, %v4143_v2  ;;  %3341 = vmatmul.msk.f32.gmra.mxu0 %vm354_vm0, %v4158_v8 }
 0x1f7   : > { %v2798_v1 = vadd.f32 %v2704_v46, %v2523_v52  ;;  %3276 = vmatmul.msk.f32.gmra.mxu2 %vm354_vm0, %v4149_v61  ;;  %v2298_v61 = vld [vmem:[#allocation2 + $0x111] sm:$0xff] }
 0x1f8   : > { %v4865_v52 = vld [vmem:[#allocation38_spill] sm:$0xff] }
 0x1f9   : > { %v2834_v10 = vadd.f32 %v4516_v14, %v2798_v1  ;;  %3309 = vmatmul.msk.f32.gmra.mxu3 %vm354_vm0, %v2297_v11 }
 0x1fa   : > { %v2157_v50 = vpop.f32.mrf.mxu2  ;;  %v1884_v35 = vpop.f32.mrf.mxu1 }
 0x1fb   : > { %2866 = vst [vmem:[%s4527_s26 + $0x8] sm:$0xff] %v2834_v10  ;;  %v2249_v18 = vadd.f32 %v2157_v50, %v1973_v55  ;;  %v2707_v2 = vpop.f32.mrf.mxu0  ;;  %v1974_v19 = vadd.f32 %v1884_v35, %v4864_v26 }
 0x1fc   : > { %v2432_v37 = vpop.f32.mrf.mxu3 }
 0x1fd   : > { %v2524_v57 = vadd.f32 %v2432_v37, %v2249_v18  ;;  %3244 = vmatmul.msk.f32.gmra.mxu1 %vm354_vm0, %v4158_v8  ;;  %3342 = vmatmul.msk.f32.gmra.mxu0 %vm354_vm0, %v4173_v31 }
 0x1ff   : > { %v2799_v62 = vadd.f32 %v2707_v2, %v2524_v57  ;;  %3277 = vmatmul.msk.f32.gmra.mxu2 %vm354_vm0, %v4164_v5  ;;  %v2299_v5 = vld [vmem:[#allocation2 + $0x121] sm:$0xff]  ;;  %v4866_v2 = vld [vmem:[#allocation39_spill] sm:$0xff] }
 0x201   : > { %v2835_v45 = vadd.f32 %v4516_v14, %v2799_v62  ;;  %3310 = vmatmul.msk.f32.gmra.mxu3 %vm354_vm0, %v2298_v61 }
 0x202   : > { %v2160_v34 = vpop.f32.mrf.mxu2  ;;  %v1887_v4 = vpop.f32.mrf.mxu1 }
 0x203   : > { %2867 = vst [vmem:[%s4527_s26 + $0x10] sm:$0xff] %v2835_v45  ;;  %v2250_v12 = vadd.f32 %v2160_v34, %v1974_v19  ;;  %v2710_v8 = vpop.f32.mrf.mxu0  ;;  %v1975_v11 = vadd.f32 %v1887_v4, %v4865_v52  ;;  %v4867_v4 = vld [vmem:[#allocation40_spill] sm:$0xff] }
 0x204   : > { %v2435_v59 = vpop.f32.mrf.mxu3 }
 0x205   : > { %v2525_v46 = vadd.f32 %v2435_v59, %v2250_v12  ;;  %3245 = vmatmul.msk.f32.gmra.mxu1 %vm354_vm0, %v4173_v31  ;;  %3343 = vmatmul.msk.f32.gmra.mxu0 %vm354_vm0, %v4188_v33 }
 0x207   : > { %v2800_v30 = vadd.f32 %v2710_v8, %v2525_v46  ;;  %3278 = vmatmul.msk.f32.gmra.mxu2 %vm354_vm0, %v4179_v17  ;;  %v2300_v17 = vld [vmem:[#allocation2 + $0x129] sm:$0xff] }
 0x209   : > { %v2836_v1 = vadd.f32 %v4516_v14, %v2800_v30  ;;  %3311 = vmatmul.msk.f32.gmra.mxu3 %vm354_vm0, %v2299_v5 }
 0x20a   : > { %v2163_v15 = vpop.f32.mrf.mxu2  ;;  %v1890_v55 = vpop.f32.mrf.mxu1 }
 0x20b   : > { %2868 = vst [vmem:[%s4527_s26 + $0x18] sm:$0xff] %v2836_v1  ;;  %v2251_v10 = vadd.f32 %v2163_v15, %v1975_v11  ;;  %v2713_v31 = vpop.f32.mrf.mxu0  ;;  %v1976_v37 = vadd.f32 %v1890_v55, %v4866_v2  ;;  %v4868_v1 = vld [vmem:[#allocation41_spill] sm:$0xff]  ;;  %v4869_v2 = vld [vmem:[#allocation42_spill] sm:$0xff] }
 0x20c   : > { %v2438_v50 = vpop.f32.mrf.mxu3 }
 0x20d   : > { %v2526_v35 = vadd.f32 %v2438_v50, %v2251_v10  ;;  %3246 = vmatmul.msk.f32.gmra.mxu1 %vm354_vm0, %v4188_v33  ;;  %3344 = vmatmul.msk.f32.gmra.mxu0 %vm354_vm0, %v4203_v9 }
 0x20f   : > { %v2801_v18 = vadd.f32 %v2713_v31, %v2526_v35  ;;  %3279 = vmatmul.msk.f32.gmra.mxu2 %vm354_vm0, %v4194_v41  ;;  %v2301_v41 = vld [vmem:[#allocation2 + $0x139] sm:$0xff] }
 0x211   : > { %v2837_v57 = vadd.f32 %v4516_v14, %v2801_v18  ;;  %3312 = vmatmul.msk.f32.gmra.mxu3 %vm354_vm0, %v2300_v17 }
 0x212   : > { %v2166_v61 = vpop.f32.mrf.mxu2  ;;  %v1893_v62 = vpop.f32.mrf.mxu1 }
 0x213   : > { %2869 = vst [vmem:[%s4527_s26 + $0x20] sm:$0xff] %v2837_v57  ;;  %v2252_v26 = vadd.f32 %v2166_v61, %v1976_v37  ;;  %v2716_v33 = vpop.f32.mrf.mxu0  ;;  %v1977_v12 = vadd.f32 %v1893_v62, %v4867_v4  ;;  %v408_v4 = vld [vmem:[%s4229_s21 + $0x20] sm:$0xff] }
 0x214   : > { %v2441_v19 = vpop.f32.mrf.mxu3  ;;  %415 = vst.msk [vmem:[#allocation2 + $0x1a0] sm:$0xff] %vm354_vm0, %v408_v4 }
 0x215   : > { %v2527_v45 = vadd.f32 %v2441_v19, %v2252_v26  ;;  %3247 = vmatmul.msk.f32.gmra.mxu1 %vm354_vm0, %v4203_v9  ;;  %3345 = vmatmul.msk.f32.gmra.mxu0 %vm354_vm0, %v4220_v32 }
 0x217   : > { %v2802_v34 = vadd.f32 %v2716_v33, %v2527_v45  ;;  %3280 = vmatmul.msk.f32.gmra.mxu2 %vm354_vm0, %v4209_v53  ;;  %v2302_v53 = vld [vmem:[#allocation2 + $0x141] sm:$0xff]  ;;  %v407_v45 = vld [vmem:[%s4229_s21 + $0x18] sm:$0xff] }
 0x218   : > { %414 = vst.msk [vmem:[#allocation2 + $0x198] sm:$0xff] %vm354_vm0, %v407_v45  ;;  %v4874_v45 = vld [vmem:[#allocation47_spill] sm:$0xff] }
 0x219   : > { %v2838_v8 = vadd.f32 %v4516_v14, %v2802_v34  ;;  %3313 = vmatmul.msk.f32.gmra.mxu3 %vm354_vm0, %v2301_v41  ;;  %v4870_v34 = vld [vmem:[#allocation44_spill] sm:$0xff] }
 0x21a   : > { %v2169_v59 = vpop.f32.mrf.mxu2  ;;  %v1896_v46 = vpop.f32.mrf.mxu1 }
 0x21b   : > { %2870 = vst [vmem:[%s4527_s26 + $0x28] sm:$0xff] %v2838_v8  ;;  %v2253_v5 = vadd.f32 %v2169_v59, %v1977_v12  ;;  %v2719_v9 = vpop.f32.mrf.mxu0  ;;  %v1978_v15 = vadd.f32 %v1896_v46, %v4868_v1  ;;  %v4871_v12 = vld [vmem:[#allocation43_spill] sm:$0xff]  ;;  %v409_v1 = vld [vmem:[%s4229_s21 + $0x28] sm:$0x3]  ;;  %s3448_s21 = scalar_lea.hbm %s4761_s4, 512 }
 0x21c   : > { %v2444_v30 = vpop.f32.mrf.mxu3  ;;  %416 = vst.msk [vmem:[#allocation2 + $0x1a8] sm:$0x3] %vm357_vm1, %v409_v1  ;;  %p3450_p2 = scmp.lt.s32.totalorder %s3448_s21, %s3444_s10 }
 0x21d   : > { %v2528_v52 = vadd.f32 %v2444_v30, %v2253_v5  ;;  %3248 = vmatmul.msk.f32.gmra.mxu1 %vm354_vm0, %v4220_v32  ;;  %3346 = vmatmul.msk.f32.gmra.mxu0 %vm354_vm0, %v4242_v25 }
 0x21e   : > { %p3451_p3 = por %p3450_p2, %p3449_p1 }
 0x21f   : > { %v2803_v11 = vadd.f32 %v2719_v9, %v2528_v52  ;;  %3281 = vmatmul.msk.f32.gmra.mxu2 %vm354_vm0, %v4231_v54  ;;  %v2303_v54 = vld [vmem:[#allocation2 + $0x151] sm:$0xff] }
 0x220   : > { %p3452_p5 = pnand %p3451_p3, %p3447_p0 }
 0x221   : > { %v2839_v55 = vadd.f32 %v4516_v14, %v2803_v11  ;;  %3314 = vmatmul.msk.f32.gmra.mxu3 %vm354_vm0, %v2302_v53  ;;  %v2305_v53 = vld [vmem:[#allocation2 + $0x169] sm:$0xff] }
 0x222   : > { %v2172_v10 = vpop.f32.mrf.mxu2  ;;  %v1899_v31 = vpop.f32.mrf.mxu1 }
 0x223   : > { %2871 = vst [vmem:[%s4527_s26 + $0x30] sm:$0xff] %v2839_v55  ;;  %v2254_v50 = vadd.f32 %v2172_v10, %v1978_v15  ;;  %v2722_v32 = vpop.f32.mrf.mxu0  ;;  %v1979_v37 = vadd.f32 %v1899_v31, %v4869_v2  ;;  %v4872_v15 = vld [vmem:[#allocation45_spill] sm:$0xff]  ;;  %v4873_v2 = vld [vmem:[#allocation46_spill] sm:$0xff] }
 0x224   : > { %v2447_v35 = vpop.f32.mrf.mxu3 }
 0x225   : > { %v2529_v17 = vadd.f32 %v2447_v35, %v2254_v50  ;;  %3249 = vmatmul.msk.f32.gmra.mxu1 %vm354_vm0, %v4242_v25  ;;  %3347 = vmatmul.msk.f32.gmra.mxu0 %vm354_vm0, %v4259_v49 }
 0x227   : > { %v2804_v18 = vadd.f32 %v2722_v32, %v2529_v17  ;;  %3282 = vmatmul.msk.f32.gmra.mxu2 %vm354_vm0, %v4248_v58  ;;  %v2304_v58 = vld [vmem:[#allocation2 + $0x159] sm:$0xff]  ;;  %v2031_v17 = vld [vmem:[#allocation2 + $0x170] sm:$0xff] }
 0x229   : > { %v2840_v57 = vadd.f32 %v4516_v14, %v2804_v18  ;;  %3315 = vmatmul.msk.f32.gmra.mxu3 %vm354_vm0, %v2303_v54 }
 0x22a   : > { %v2175_v61 = vpop.f32.mrf.mxu2  ;;  %v1902_v62 = vpop.f32.mrf.mxu1 }
 0x22b   : > { %2872 = vst [vmem:[%s4527_s26 + $0x38] sm:$0xff] %v2840_v57  ;;  %v2255_v25 = vadd.f32 %v2175_v61, %v1979_v37  ;;  %v2725_v26 = vpop.f32.mrf.mxu0  ;;  %v1980_v8 = vadd.f32 %v1902_v62, %v4871_v12 }
 0x22c   : > { %v2450_v33 = vpop.f32.mrf.mxu3 }
 0x22d   : > { %v2530_v19 = vadd.f32 %v2450_v33, %v2255_v25  ;;  %3250 = vmatmul.msk.f32.gmra.mxu1 %vm354_vm0, %v4259_v49  ;;  %3348 = vmatmul.msk.f32.gmra.mxu0 %vm354_vm0, %v4276_v23  ;;  %v1756_v25 = vld [vmem:[#allocation2 + $0x16a] sm:$0xff] }
 0x22f   : > { %v2805_v41 = vadd.f32 %v2725_v26, %v2530_v19  ;;  %3283 = vmatmul.msk.f32.gmra.mxu2 %vm354_vm0, %v4870_v34 }
 0x231   : > { %v2841_v59 = vadd.f32 %v4516_v14, %v2805_v41  ;;  %3316 = vmatmul.msk.f32.gmra.mxu3 %vm354_vm0, %v2304_v58 }
 0x232   : > { %v2178_v49 = vpop.f32.mrf.mxu2  ;;  %v1905_v46 = vpop.f32.mrf.mxu1 }
 0x233   : > { %2873 = vst [vmem:[%s4527_s26 + $0x40] sm:$0xff] %v2841_v59  ;;  %v2256_v5 = vadd.f32 %v2178_v49, %v1980_v8  ;;  %v2728_v9 = vpop.f32.mrf.mxu0  ;;  %v1981_v55 = vadd.f32 %v1905_v46, %v4872_v15  ;;  %v1757_v8 = vld [vmem:[#allocation2 + $0x172] sm:$0xff]  ;;  %v2582_v59 = vld [vmem:[#allocation2 + $0x182] sm:$0xff] }
 0x234   : > { %v2453_v30 = vpop.f32.mrf.mxu3 }
 0x235   : > { %v2531_v52 = vadd.f32 %v2453_v30, %v2256_v5  ;;  %3251 = vmatmul.msk.f32.gmra.mxu1 %vm354_vm0, %v4276_v23  ;;  %3349 = vmatmul.msk.f32.gmra.mxu0 %vm354_vm0, %v4291_v3  ;;  %v1755_v23 = vld [vmem:[#allocation2 + $0x15a] sm:$0xff] }
 0x237   : > { %v2806_v11 = vadd.f32 %v2728_v9, %v2531_v52  ;;  %3284 = vmatmul.msk.f32.gmra.mxu2 %vm354_vm0, %v4282_v7  ;;  %v2306_v7 = vld [vmem:[#allocation2 + $0x171] sm:$0xff]  ;;  %v4875_v9 = vld [vmem:[#allocation48_spill] sm:$0xff] }
 0x239   : > { %v2842_v10 = vadd.f32 %v4516_v14, %v2806_v11  ;;  %3317 = vmatmul.msk.f32.gmra.mxu3 %vm354_vm0, %v2305_v53  ;;  %v2583_v11 = vld [vmem:[#allocation2 + $0x18a] sm:$0xff] }
 0x23a   : > { %v2181_v31 = vpop.f32.mrf.mxu2  ;;  %v1908_v50 = vpop.f32.mrf.mxu1 }
 0x23b   : > { %2874 = vst [vmem:[%s4527_s26 + $0x48] sm:$0xff] %v2842_v10  ;;  %v2257_v32 = vadd.f32 %v2181_v31, %v1981_v55  ;;  %v2731_v3 = vpop.f32.mrf.mxu0  ;;  %v1982_v37 = vadd.f32 %v1908_v50, %v4873_v2  ;;  %v2034_v10 = vld [vmem:[#allocation2 + $0x198] sm:$0xff] }
 0x23c   : > { %v2456_v35 = vpop.f32.mrf.mxu3 }
 0x23d   : > { %v2532_v54 = vadd.f32 %v2456_v35, %v2257_v32  ;;  %3252 = vmatmul.msk.f32.gmra.mxu1 %vm354_vm0, %v1755_v23  ;;  %3350 = vmatmul.msk.f32.gmra.mxu0 %vm354_vm0, %v4303_v44  ;;  %v2584_v35 = vld [vmem:[#allocation2 + $0x19a] sm:$0xff] }
 0x23f   : > { %v2807_v18 = vadd.f32 %v2731_v3, %v2532_v54  ;;  %3285 = vmatmul.msk.f32.gmra.mxu2 %vm354_vm0, %v2031_v17 }
 0x241   : > { %v2843_v57 = vadd.f32 %v4516_v14, %v2807_v18  ;;  %3318 = vmatmul.msk.f32.gmra.mxu3 %vm354_vm0, %v2306_v7  ;;  %v2035_v18 = vld [vmem:[#allocation2 + $0x1a0] sm:$0xff] }
 0x242   : > { %v2184_v61 = vpop.f32.mrf.mxu2  ;;  %v1911_v62 = vpop.f32.mrf.mxu1 }
 0x243   : > { %2875 = vst [vmem:[%s4527_s26 + $0x50] sm:$0xff] %v2843_v57  ;;  %v2258_v26 = vadd.f32 %v2184_v61, %v1982_v37  ;;  %v2734_v33 = vpop.f32.mrf.mxu0  ;;  %v1983_v41 = vadd.f32 %v1911_v62, %v4874_v45  ;;  %v2310_v37 = vld [vmem:[#allocation2 + $0x1a1] sm:$0xff] }
 0x244   : > { %v2459_v19 = vpop.f32.mrf.mxu3 }
 0x245   : > { %v2533_v58 = vadd.f32 %v2459_v19, %v2258_v26  ;;  %3253 = vmatmul.msk.f32.gmra.mxu1 %vm354_vm0, %v1756_v25  ;;  %3351 = vmatmul.msk.f32.gmra.mxu0 %vm354_vm0, %v4320_v27  ;;  %v2585_v26 = vld [vmem:[#allocation2 + $0x1a2] sm:$0xff] }
 0x247   : > { %v2808_v44 = vadd.f32 %v2734_v33, %v2533_v58  ;;  %3286 = vmatmul.msk.f32.gmra.mxu2 %vm354_vm0, %v4309_v21 }
 0x249   : > { %v2844_v34 = vadd.f32 %v4516_v14, %v2808_v44  ;;  %3319 = vmatmul.msk.f32.gmra.mxu3 %vm354_vm0, %v4318_v29 }
 0x24a   : > { %v2187_v4 = vpop.f32.mrf.mxu2  ;;  %v1914_v12 = vpop.f32.mrf.mxu1 }
 0x24b   : > { %2876 = vst [vmem:[%s4527_s26 + $0x58] sm:$0xff] %v2844_v34  ;;  %v2259_v49 = vadd.f32 %v2187_v4, %v1983_v41  ;;  %v2737_v46 = vpop.f32.mrf.mxu0  ;;  %v1984_v29 = vadd.f32 %v1914_v12, %v4875_v9 }
 0x24c   : > { %v2462_v27 = vpop.f32.mrf.mxu3 }
 0x24d   : > { %v2534_v5 = vadd.f32 %v2462_v27, %v2259_v49  ;;  %3254 = vmatmul.msk.f32.gmra.mxu1 %vm354_vm0, %v1757_v8  ;;  %3352 = vmatmul.msk.f32.gmra.mxu0 %vm354_vm0, %v2582_v59 }
 0x24f   : > { %v2809_v21 = vadd.f32 %v2737_v46, %v2534_v5  ;;  %3287 = vmatmul.msk.f32.gmra.mxu2 %vm354_vm0, %v4325_v0  ;;  %v2309_v0 = vld [vmem:[#allocation2 + $0x199] sm:$0xff] }
 0x251   : > { %v2845_v30 = vadd.f32 %v4516_v14, %v2809_v21  ;;  %3320 = vmatmul.msk.f32.gmra.mxu3 %vm354_vm0, %v4334_v13 }
 0x252   : > { %v2190_v52 = vpop.f32.mrf.mxu2  ;;  %v1917_v53 = vpop.f32.mrf.mxu1 }
 0x253   : > { %2877 = vst [vmem:[%s4527_s26 + $0x60] sm:$0xff] %v2845_v30  ;;  %v2260_v1 = vadd.f32 %v2190_v52, %v1984_v29  ;;  %v2740_v15 = vpop.f32.mrf.mxu0  ;;  %v1985_v13 = vadd.f32 %v1917_v53, %v4327_v60 }
 0x254   : > { %v2465_v55 = vpop.f32.mrf.mxu3 }
 0x255   : > { %v2535_v31 = vadd.f32 %v2465_v55, %v2260_v1  ;;  %3255 = vmatmul.msk.f32.gmra.mxu1 %vm354_vm0, %v2582_v59  ;;  %3353 = vmatmul.msk.f32.gmra.mxu0 %vm354_vm0, %v2583_v11 }
 0x257   : > { %v2810_v50 = vadd.f32 %v2740_v15, %v2535_v31  ;;  %3288 = vmatmul.msk.f32.gmra.mxu2 %vm354_vm0, %v2034_v10 }
 0x259   : > { %v2846_v23 = vadd.f32 %v4516_v14, %v2810_v50  ;;  %3321 = vmatmul.msk.f32.gmra.mxu3 %vm354_vm0, %v2309_v0 }
 0x25a   : > { %v2193_v32 = vpop.f32.mrf.mxu2  ;;  %v1920_v3 = vpop.f32.mrf.mxu1 }
 0x25b   : > { %2878 = vst [vmem:[%s4527_s26 + $0x68] sm:$0xff] %v2846_v23  ;;  %v2261_v17 = vadd.f32 %v2193_v32, %v1985_v13  ;;  %v2743_v54 = vpop.f32.mrf.mxu0  ;;  %v1986_v57 = vadd.f32 %v1920_v3, %v4340_v56 }
 0x25c   : > { %v2468_v7 = vpop.f32.mrf.mxu3 }
 0x25d   : > { %v2536_v2 = vadd.f32 %v2468_v7, %v2261_v17  ;;  %3256 = vmatmul.msk.f32.gmra.mxu1 %vm354_vm0, %v2583_v11  ;;  %3354 = vmatmul.msk.f32.gmra.mxu0 %vm354_vm0, %v2584_v35 }
 0x25f   : > { %v2811_v60 = vadd.f32 %v2743_v54, %v2536_v2  ;;  %3289 = vmatmul.msk.f32.gmra.mxu2 %vm354_vm0, %v2035_v18 }
 0x261   : > { %v2847_v61 = vadd.f32 %v4516_v14, %v2811_v60  ;;  %3322 = vmatmul.msk.f32.gmra.mxu3 %vm354_vm0, %v2310_v37 }
 0x262   : > { %v2196_v62 = vpop.f32.mrf.mxu2  ;;  %v1923_v25 = vpop.f32.mrf.mxu1 }
 0x263   : > { %2879 = vst [vmem:[%s4527_s26 + $0x70] sm:$0xff] %v2847_v61  ;;  %v2262_v33 = vadd.f32 %v2196_v62, %v1986_v57  ;;  %v2746_v19 = vpop.f32.mrf.mxu0  ;;  %v1987_v41 = vadd.f32 %v1923_v25, %v4351_v38 }
 0x264   : > { %v2471_v58 = vpop.f32.mrf.mxu3 }
 0x265   : > { %v2537_v44 = vadd.f32 %v2471_v58, %v2262_v33  ;;  %3355 = vmatmul.msk.f32.gmra.mxu0 %vm354_vm0, %v2585_v26 }
 0x267   : > { %v2812_v45 = vadd.f32 %v2746_v19, %v2537_v44 }
 0x269   : > { %v2848_v56 = vadd.f32 %v4516_v14, %v2812_v45 }
 0x26a   : > { %v2199_v34 = vpop.f32.mrf.mxu2  ;;  %v1926_v4 = vpop.f32.mrf.mxu1 }
 0x26b   : > { %2880 = vst [vmem:[%s4527_s26 + $0x78] sm:$0xff] %v2848_v56  ;;  %v2263_v12 = vadd.f32 %v2199_v34, %v1987_v41  ;;  %v2749_v8 = vpop.f32.mrf.mxu0  ;;  %v1988_v27 = vadd.f32 %v1926_v4, %v4362_v40 }
 0x26c   : > { %v2474_v59 = vpop.f32.mrf.mxu3 }
 0x26d   : > { %v2538_v49 = vadd.f32 %v2474_v59, %v2263_v12 }
 0x26f   : > { %v2813_v46 = vadd.f32 %v2749_v8, %v2538_v49 }
 0x271   : > { %v2849_v5 = vadd.f32 %v4516_v14, %v2813_v46 }
 0x272   : > { %v2202_v21 = vpop.f32.mrf.mxu2  ;;  %v1929_v9 = vpop.f32.mrf.mxu1 }
 0x273   : > { %2881 = vst [vmem:[%s4527_s26 + $0x80] sm:$0xff] %v2849_v5  ;;  %v2264_v29 = vadd.f32 %v2202_v21, %v1988_v27  ;;  %v2752_v38 = vpop.f32.mrf.mxu0  ;;  %v1989_v11 = vadd.f32 %v1929_v9, %v4373_v43 }
 0x274   : > { %v2477_v30 = vpop.f32.mrf.mxu3 }
 0x275   : > { %v2539_v52 = vadd.f32 %v2477_v30, %v2264_v29 }
 0x277   : > { %v2814_v53 = vadd.f32 %v2752_v38, %v2539_v52 }
 0x279   : > { %v2850_v1 = vadd.f32 %v4516_v14, %v2814_v53 }
 0x27a   : > { %v2205_v15 = vpop.f32.mrf.mxu2  ;;  %v1932_v55 = vpop.f32.mrf.mxu1 }
 0x27b   : > { %2882 = vst [vmem:[%s4527_s26 + $0x88] sm:$0xff] %v2850_v1  ;;  %v2265_v10 = vadd.f32 %v2205_v15, %v1989_v11  ;;  %v2755_v40 = vpop.f32.mrf.mxu0  ;;  %v1990_v13 = vadd.f32 %v1932_v55, %v4384_v16 }
 0x27c   : > { %v2480_v31 = vpop.f32.mrf.mxu3 }
 0x27d   : > { %v2540_v0 = vadd.f32 %v2480_v31, %v2265_v10 }
 0x27f   : > { %v2815_v50 = vadd.f32 %v2755_v40, %v2540_v0 }
 0x281   : > { %v2851_v23 = vadd.f32 %v4516_v14, %v2815_v50 }
 0x282   : > { %v2208_v32 = vpop.f32.mrf.mxu2  ;;  %v1935_v3 = vpop.f32.mrf.mxu1 }
 0x283   : > { %2883 = vst [vmem:[%s4527_s26 + $0x90] sm:$0xff] %v2851_v23  ;;  %v2266_v35 = vadd.f32 %v2208_v32, %v1990_v13  ;;  %v2758_v43 = vpop.f32.mrf.mxu0  ;;  %v1991_v18 = vadd.f32 %v1935_v3, %v4394_v42 }
 0x284   : > { %v2483_v17 = vpop.f32.mrf.mxu3 }
 0x285   : > { %v2541_v54 = vadd.f32 %v2483_v17, %v2266_v35 }
 0x287   : > { %v2816_v7 = vadd.f32 %v2758_v43, %v2541_v54 }
 0x289   : > { %v2852_v2 = vadd.f32 %v4516_v14, %v2816_v7 }
 0x28a   : > { %v2211_v37 = vpop.f32.mrf.mxu2  ;;  %v1938_v60 = vpop.f32.mrf.mxu1 }
 0x28b   : > { %2884 = vst [vmem:[%s4527_s26 + $0x98] sm:$0xff] %v2852_v2  ;;  %v2267_v57 = vadd.f32 %v2211_v37, %v1991_v18  ;;  %v2761_v16 = vpop.f32.mrf.mxu0  ;;  %v1992_v26 = vadd.f32 %v1938_v60, %v4404_v6 }
 0x28c   : > { %v2486_v61 = vpop.f32.mrf.mxu3 }
 0x28d   : > { %v2542_v62 = vadd.f32 %v2486_v61, %v2267_v57 }
 0x28f   : > { %v2817_v25 = vadd.f32 %v2761_v16, %v2542_v62 }
 0x291   : > { %v2853_v33 = vadd.f32 %v4516_v14, %v2817_v25 }
 0x292   : > { %v2214_v19 = vpop.f32.mrf.mxu2  ;;  %v1941_v58 = vpop.f32.mrf.mxu1 }
 0x293   : > { %2885 = vst [vmem:[%s4527_s26 + $0xa0] sm:$0xff] %v2853_v33  ;;  %v2268_v44 = vadd.f32 %v2214_v19, %v1992_v26  ;;  %v2764_v42 = vpop.f32.mrf.mxu0  ;;  %v1993_v34 = vadd.f32 %v1941_v58, %v4414_v22 }
 0x294   : > { %v2489_v45 = vpop.f32.mrf.mxu3 }
 0x295   : > { %v2543_v41 = vadd.f32 %v2489_v45, %v2268_v44 }
 0x297   : > { %v2818_v56 = vadd.f32 %v2764_v42, %v2543_v41 }
 0x299   : > { %v2854_v4 = vadd.f32 %v4516_v14, %v2818_v56 }
 0x29a   : > { %v2217_v12 = vpop.f32.mrf.mxu2  ;;  %v1944_v8 = vpop.f32.mrf.mxu1 }
 0x29b   : > { %2886 = vst [vmem:[%s4527_s26 + $0xa8] sm:$0xff] %v2854_v4  ;;  %v2269_v59 = vadd.f32 %v2217_v12, %v1993_v34  ;;  %v2767_v6 = vpop.f32.mrf.mxu0  ;;  %v1994_v5 = vadd.f32 %v1944_v8, %v4424_v51 }
 0x29c   : > { %v2492_v49 = vpop.f32.mrf.mxu3 }
 0x29d   : > { %v2544_v46 = vadd.f32 %v2492_v49, %v2269_v59 }
 0x29f   : > { %v2819_v27 = vadd.f32 %v2767_v6, %v2544_v46 }
 0x2a1   : > { %v2855_v21 = vadd.f32 %v4516_v14, %v2819_v27 }
 0x2a2   : > { %v2220_v9 = vpop.f32.mrf.mxu2  ;;  %v1947_v29 = vpop.f32.mrf.mxu1 }
 0x2a3   : > { %2887 = vst [vmem:[%s4527_s26 + $0xb0] sm:$0xff] %v2855_v21  ;;  %v2270_v38 = vadd.f32 %v2220_v9, %v1994_v5  ;;  %v2770_v22 = vpop.f32.mrf.mxu0  ;;  %v1995_v11 = vadd.f32 %v1947_v29, %v4434_v36 }
 0x2a4   : > { %v2495_v30 = vpop.f32.mrf.mxu3 }
 0x2a5   : > { %v2545_v52 = vadd.f32 %v2495_v30, %v2270_v38 }
 0x2a7   : > { %v2820_v53 = vadd.f32 %v2770_v22, %v2545_v52 }
 0x2a9   : > { %v2856_v1 = vadd.f32 %v4516_v14, %v2820_v53 }
 0x2aa   : > { %v2223_v15 = vpop.f32.mrf.mxu2  ;;  %v1950_v55 = vpop.f32.mrf.mxu1 }
 0x2ab   : > { %2888 = vst [vmem:[%s4527_s26 + $0xb8] sm:$0xff] %v2856_v1  ;;  %v2271_v10 = vadd.f32 %v2223_v15, %v1995_v11  ;;  %v2773_v51 = vpop.f32.mrf.mxu0  ;;  %v1996_v50 = vadd.f32 %v1950_v55, %v4444_v24 }
 0x2ac   : > { %v2498_v40 = vpop.f32.mrf.mxu3 }
 0x2ad   : > { %v2546_v31 = vadd.f32 %v2498_v40, %v2271_v10 }
 0x2af   : > { %v2821_v0 = vadd.f32 %v2773_v51, %v2546_v31 }
 0x2b1   : > { %v2857_v13 = vadd.f32 %v4516_v14, %v2821_v0 }
 0x2b2   : > { %v2226_v23 = vpop.f32.mrf.mxu2  ;;  %v1953_v32 = vpop.f32.mrf.mxu1 }
 0x2b3   : > { %2889 = vst [vmem:[%s4527_s26 + $0xc0] sm:$0xff] %v2857_v13  ;;  %v2272_v3 = vadd.f32 %v2226_v23, %v1996_v50  ;;  %v2776_v36 = vpop.f32.mrf.mxu0  ;;  %v1997_v54 = vadd.f32 %v1953_v32, %v4454_v48 }
 0x2b4   : > { %v2501_v35 = vpop.f32.mrf.mxu3 }
 0x2b5   : > { %v2547_v43 = vadd.f32 %v2501_v35, %v2272_v3 }
 0x2b7   : > { %v2822_v17 = vadd.f32 %v2776_v36, %v2547_v43 }
 0x2b9   : > { %v2858_v7 = vadd.f32 %v4516_v14, %v2822_v17 }
 0x2ba   : > { %v2229_v18 = vpop.f32.mrf.mxu2  ;;  %v1956_v2 = vpop.f32.mrf.mxu1 }
 0x2bb   : > { %2890 = vst [vmem:[%s4527_s26 + $0xc8] sm:$0xff] %v2858_v7  ;;  %v2273_v37 = vadd.f32 %v2229_v18, %v1997_v54  ;;  %v2779_v24 = vpop.f32.mrf.mxu0  ;;  %v1998_v61 = vadd.f32 %v1956_v2, %v4464_v39 }
 0x2bc   : > { %v2504_v60 = vpop.f32.mrf.mxu3 }
 0x2bd   : > { %v2548_v57 = vadd.f32 %v2504_v60, %v2273_v37 }
 0x2bf   : > { %v2823_v16 = vadd.f32 %v2779_v24, %v2548_v57 }
 0x2c1   : > { %v2859_v62 = vadd.f32 %v4516_v14, %v2823_v16 }
 0x2c2   : > { %v2232_v25 = vpop.f32.mrf.mxu2  ;;  %v1959_v26 = vpop.f32.mrf.mxu1 }
 0x2c3   : > { %2891 = vst [vmem:[%s4527_s26 + $0xd0] sm:$0xff] %v2859_v62  ;;  %v2274_v33 = vadd.f32 %v2232_v25, %v1998_v61  ;;  %v2782_v48 = vpop.f32.mrf.mxu0  ;;  %v1999_v42 = vadd.f32 %v1959_v26, %v4474_v63 }
 0x2c4   : > { %v2507_v19 = vpop.f32.mrf.mxu3 }
 0x2c5   : > { %v2549_v58 = vadd.f32 %v2507_v19, %v2274_v33 }
 0x2c7   : > { %v2824_v44 = vadd.f32 %v2782_v48, %v2549_v58 }
 0x2c9   : > { %v2860_v45 = vadd.f32 %v4516_v14, %v2824_v44 }
 0x2ca   : > { %v2235_v41 = vpop.f32.mrf.mxu2  ;;  %v1962_v56 = vpop.f32.mrf.mxu1 }
 0x2cb   : > { %2892 = vst [vmem:[%s4527_s26 + $0xd8] sm:$0xff] %v2860_v45  ;;  %v2275_v34 = vadd.f32 %v2235_v41, %v1999_v42  ;;  %v2785_v39 = vpop.f32.mrf.mxu0  ;;  %v2000_v59 = vadd.f32 %v1962_v56, %v4484_v47 }
 0x2cc   : > { %v2510_v4 = vpop.f32.mrf.mxu3 }
 0x2cd   : > { %v2550_v12 = vadd.f32 %v2510_v4, %v2275_v34 }
 0x2cf   : > { %v2825_v8 = vadd.f32 %v2785_v39, %v2550_v12 }
 0x2d1   : > { %v2861_v6 = vadd.f32 %v4516_v14, %v2825_v8 }
 0x2d2   : > { %v2238_v49 = vpop.f32.mrf.mxu2  ;;  %v1965_v27 = vpop.f32.mrf.mxu1 }
 0x2d3   : > { %2893 = vst [vmem:[%s4527_s26 + $0xe0] sm:$0xff] %v2861_v6  ;;  %v2276_v46 = vadd.f32 %v2238_v49, %v2000_v59  ;;  %v2788_v63 = vpop.f32.mrf.mxu0  ;;  %v2001_v29 = vadd.f32 %v1965_v27, %v4494_v20 }
 0x2d4   : > { %v2513_v5 = vpop.f32.mrf.mxu3 }
 0x2d5   : > { %v2551_v21 = vadd.f32 %v2513_v5, %v2276_v46 }
 0x2d7   : > { %v2826_v9 = vadd.f32 %v2788_v63, %v2551_v21 }
 0x2d9   : > { %v2862_v38 = vadd.f32 %v4516_v14, %v2826_v9 }
 0x2da   : > { %v2241_v22 = vpop.f32.mrf.mxu2  ;;  %v1968_v11 = vpop.f32.mrf.mxu1 }
 0x2db   : > { %2894 = vst [vmem:[%s4527_s26 + $0xe8] sm:$0xff] %v2862_v38  ;;  %v2277_v30 = vadd.f32 %v2241_v22, %v2001_v29  ;;  %v2791_v47 = vpop.f32.mrf.mxu0  ;;  %v2002_v15 = vadd.f32 %v1968_v11, %v4504_v28 }
 0x2dc   : > { %v2516_v52 = vpop.f32.mrf.mxu3 }
 0x2dd   : > { %v2552_v53 = vadd.f32 %v2516_v52, %v2277_v30 }
 0x2df   : > { %v2827_v1 = vadd.f32 %v2791_v47, %v2552_v53 }
 0x2e1   : > { %v2863_v55 = vadd.f32 %v4516_v14, %v2827_v1 }
 0x2e2   : > { %v2244_v10 = vpop.f32.mrf.mxu2 }
 0x2e3   : > { %2895 = vst [vmem:[%s4527_s26 + $0xf0] sm:$0xff] %v2863_v55  ;;  %v2278_v20 = vadd.f32 %v2244_v10, %v2002_v15  ;;  %v2794_v40 = vpop.f32.mrf.mxu0 }
 0x2e4   : > { %v2519_v51 = vpop.f32.mrf.mxu3 }
 0x2e5   : > { %v2553_v31 = vadd.f32 %v2519_v51, %v2278_v20 }
 0x2e7   : > { %v2828_v0 = vadd.f32 %v2794_v40, %v2553_v31 }
 0x2e9   : > { %v2864_v28 = vadd.f32 %v4516_v14, %v2828_v0 }
 0x2eb   : > { %2896 = vst [vmem:[%s4527_s26 + $0xf8] sm:$0xff] %v2864_v28 }
 0x2ec   : > { %3455 = shalt.err (!%p3452_p5)
}
 0x2ed   : > { %s3508_s11 = smov 128   ;;  %s3509_s24 = smov 8  }
 0x2ee   : > { %3369 = dma.vmem_to_hbm [thread:$0]  (%p3575_p4), %s2914_s7, 4096, %s2916_s8, %s2898_s18, %s3508_s11, %s3508_s11, %s3509_s24  }
 0x2ef PF: > { %p3376_p6 = scmp.ge.s32.totalorder %s3506_s20, 2  ;;  %s2930_s26 = sand.u32 1, %s3486_s15  }
 0x2f0   : > { %s2931_s29 = scalar_lea.sflag [#allocation4], %s2930_s26 }
 0x2f1   : > { %p3372_p7 = pnand %p3376_p6, %p3582_p8 }
 0x2f3   : > { %p3373_p9 = pneg %p3372_p7 }
 0x2f5   : > { %3481 = dma.done.wait (%p3373_p9), %s2931_s29, 4096  }
 0x2f6   : > { %3483 = vsyncadd (%p3373_p9), %s2931_s29, 4294963200  ;;  %s17_s20 = sadd.s32 1, %s3506_s20   ;;  %s4876_s15 = smov %s3490_s16 }
 0x2f7   : > { %p14_p10 = scmp.ge.s32.totalorder %s17_s20, 4   ;;  %s4877_s16 = smov %s3494_s17 }
 0x2f8   : > { %s4878_s17 = smov %s3588_s28  ;;  %s4879_s18 = smov %s3502_s19 }
 0x2f9   : > { %s4880_s19 = smov %s4882_s23  ;;  %16 = sbr.rel (!%p14_p10) target bundleno = 4 (0x4), region = 91 }
 0x2fe   :  { %2937 = vsyncpa [#allocation4], 1 }
 0x2ff   :  { %2939 = vsyncpa [#allocation4 + $0x1], 1 }

</bundles_post_ra>
